<compile_context>
chip_gen: v7x
topology: tpu7x:2x2x1
jax: 0.10.0
libtpu: 0.0.40
codegen_flags: <defaults>
</compile_context>

<pallas_src>
import jax
import jax.numpy as jnp
from jax.experimental import pallas as pl
from jax.experimental.pallas import tpu as pltpu

LN_EPS = 1e-5   # PyTorch nn.LayerNorm default
LANE = 128
SUBLANE = 8


def _round_up(n, m):
    return ((n + m - 1) // m) * m


# --------------------------------------------------------------------------- #
# One-time parameter preparation (hoisted out of the per-call path).
# --------------------------------------------------------------------------- #
def prepare_params(params, matmul_dtype=jnp.bfloat16):
    """Cast weights to bf16 and pad feature dims to 128-lane multiples ONCE.

    LayerNorm gamma/beta are padded with ZEROS so padded hidden lanes stay
    exactly 0 through LN+ReLU, and the kernel normalizes by the true
    hidden_dim, so results are identical to the unpadded math.
    """
    (w1, b1, g1, be1, w2, b2, g2, be2, w3, b3) = params
    input_dim, hidden_dim = w1.shape
    out_dim = w3.shape[1]
    hp = _round_up(hidden_dim, LANE)
    op = _round_up(out_dim, LANE)
    dh, do = hp - hidden_dim, op - out_dim

    if dh:
        w1 = jnp.pad(w1, ((0, 0), (0, dh)))
        b1 = jnp.pad(b1, ((0, 0), (0, dh)))
        g1 = jnp.pad(g1, ((0, 0), (0, dh)))      # zero gamma on pad lanes
        be1 = jnp.pad(be1, ((0, 0), (0, dh)))    # zero beta  on pad lanes
        w2 = jnp.pad(w2, ((0, dh), (0, dh)))
        b2 = jnp.pad(b2, ((0, 0), (0, dh)))
        g2 = jnp.pad(g2, ((0, 0), (0, dh)))
        be2 = jnp.pad(be2, ((0, 0), (0, dh)))
        w3 = jnp.pad(w3, ((0, dh), (0, 0)))
    if do:
        w3 = jnp.pad(w3, ((0, 0), (0, do)))
        b3 = jnp.pad(b3, ((0, 0), (0, do)))

    return dict(
        w1=w1.astype(matmul_dtype), b1=b1, g1=g1, be1=be1,
        w2=w2.astype(matmul_dtype), b2=b2, g2=g2, be2=be2,
        w3=w3.astype(matmul_dtype), b3=b3,
        input_dim=int(input_dim), hidden_dim=int(hidden_dim), out_dim=int(out_dim),
    )


# --------------------------------------------------------------------------- #
# Kernel
# --------------------------------------------------------------------------- #
def _make_kernel(hidden_true):
    inv_n = 1.0 / float(hidden_true)

    def kernel(x_ref,
               w1_ref, b1_ref, g1_ref, be1_ref,
               w2_ref, b2_ref, g2_ref, be2_ref,
               w3_ref, b3_ref,
               o_ref):
        mm_dtype = w1_ref.dtype          # bf16 matmul inputs; f32 accumulate
        x = x_ref[...].astype(mm_dtype)

        def ln_relu(h, g, b):
            # One-pass LayerNorm over the TRUE hidden width: padded lanes are
            # exactly 0 so they don't perturb either sum; normalize by inv_n.
            s = jnp.sum(h, axis=-1, keepdims=True)
            sq = jnp.sum(h * h, axis=-1, keepdims=True)
            mean = s * inv_n
            var = sq * inv_n - mean * mean
            inv = jax.lax.rsqrt(var + LN_EPS)
            return jnp.maximum((h - mean) * inv * g + b, 0.0)

        # fc1 -> ln1 -> relu   (bias/LN/ReLU in f32)
        h1 = jnp.dot(x, w1_ref[...], preferred_element_type=jnp.float32) + b1_ref[...]
        h1 = ln_relu(h1, g1_ref[...], be1_ref[...])

        # fc2 -> ln2 -> relu
        h2 = jnp.dot(h1.astype(mm_dtype), w2_ref[...],
                     preferred_element_type=jnp.float32) + b2_ref[...]
        h2 = ln_relu(h2, g2_ref[...], be2_ref[...])

        # fc3 -> tanh (out_fn='tanh')
        out = jnp.dot(h2.astype(mm_dtype), w3_ref[...],
                      preferred_element_type=jnp.float32) + b3_ref[...]
        o_ref[...] = jnp.tanh(out).astype(o_ref.dtype)

    return kernel


# --------------------------------------------------------------------------- #
# Wrapper
# --------------------------------------------------------------------------- #
def mlp_forward(x, prep, *, block_batch=None, out_dtype=None):
    """Fused MLP forward. `prep` comes from prepare_params() (weights already
    bf16 + lane-padded, so no per-call cast/pad traffic)."""
    w1, b1, g1, be1 = prep["w1"], prep["b1"], prep["g1"], prep["be1"]
    w2, b2, g2, be2 = prep["w2"], prep["b2"], prep["g2"], prep["be2"]
    w3, b3 = prep["w3"], prep["b3"]
    hidden_true, out_dim = prep["hidden_dim"], prep["out_dim"]

    batch, input_dim = x.shape
    assert input_dim == prep["input_dim"]
    hp = w1.shape[1]            # padded hidden width
    out_pad = w3.shape[1]       # padded output width (128-lane multiple)
    out_dtype = x.dtype if out_dtype is None else jnp.dtype(out_dtype)

    # ---- Batch tile: 8-sublane multiple, regime-tuned, >=2 grid steps. -------
    if block_batch is None:
        block_batch = 128 if hp >= 2048 else (256 if hp >= 1024 else 512)
    tb = min(_round_up(block_batch, SUBLANE), _round_up(batch, SUBLANE))
    if batch >= 2 * SUBLANE:
        # Ensure grid has >= 2 steps so ("parallel",) can feed both TCs on v7x.
        tb = min(tb, _round_up((batch + 1) // 2, SUBLANE))
    tb = max(tb, SUBLANE)
    batch_pad = _round_up(batch, tb)
    xp = jnp.pad(x, ((0, batch_pad - batch), (0, 0))) if batch_pad != batch else x
    grid = (batch_pad // tb,)

    # ---- Advisory cost estimate. ----------------------------------------------
    weight_bytes = sum(int(a.size) * jnp.dtype(a.dtype).itemsize for a in (w1, w2, w3))
    vec_bytes = sum(int(a.size) * jnp.dtype(a.dtype).itemsize
                    for a in (b1, g1, be1, b2, g2, be2, b3))
    flops = 2 * batch_pad * (input_dim * hp + hp * hp + hp * out_pad)
    bytes_accessed = (int(xp.size) * xp.dtype.itemsize
                      + batch_pad * out_pad * jnp.dtype(out_dtype).itemsize
                      + weight_bytes + vec_bytes)
    cost = pl.CostEstimate(
        flops=flops,
        # rsqrt: one per row per LayerNorm (2 LNs); tanh: one per output element.
        transcendentals=2 * batch_pad + batch_pad * out_pad,
        bytes_accessed=bytes_accessed,
    )

    # ---- VMEM budget: actual footprint, capped below physical per-core VMEM. --
    try:
        vmem_cap = int(pltpu.get_tpu_info().vmem_capacity_bytes)
    except Exception:
        vmem_cap = 64 * 1024 * 1024   # conservative (v7x-sized) fallback
    # TODO(synk): if resident bf16 weights alone approach the VMEM budget
    # (hidden_dim >= ~4-5K on v7x), stop keeping w2/w3 fully resident and add a
    # K-tiled grid axis ("arbitrary") with a VMEM f32 accumulator instead.

    kernel = _make_kernel(hidden_true)
    operands = (xp, w1, b1, g1, be1, w2, b2, g2, be2, w3, b3)

    def _run(single_buffer_weights):
        if single_buffer_weights:
            # Constant index_map -> fetched once; one buffer halves resident VMEM.
            resident = lambda shp: pl.BlockSpec(shp, lambda i: (0, 0),
                                                pipeline_mode=pl.Buffered(1))
            wbuf = 1
        else:
            resident = lambda shp: pl.BlockSpec(shp, lambda i: (0, 0))
            wbuf = 2
        io_bytes = (2 * tb * input_dim * xp.dtype.itemsize
                    + 2 * tb * out_pad * jnp.dtype(out_dtype).itemsize)
        scratch_bytes = tb * (2 * hp + out_pad) * 4          # f32 intermediates
        need = wbuf * (weight_bytes + vec_bytes) + io_bytes + scratch_bytes
        vmem_limit = int(min(vmem_cap * 7 // 8,              # headroom (~56 MiB on v7x)
                             max(32 * 1024 * 1024, 2 * need)))
        return pl.pallas_call(
            kernel,
            out_shape=jax.ShapeDtypeStruct((batch_pad, out_pad), out_dtype),
            grid=grid,
            in_specs=[
                pl.BlockSpec((tb, input_dim), lambda i: (i, 0)),
                resident(w1.shape), resident(b1.shape),
                resident(g1.shape), resident(be1.shape),
                resident(w2.shape), resident(b2.shape),
                resident(g2.shape), resident(be2.shape),
                resident(w3.shape), resident(b3.shape),
            ],
            out_specs=pl.BlockSpec((tb, out_pad), lambda i: (i, 0)),
            compiler_params=pltpu.CompilerParams(
                dimension_semantics=("parallel",),   # megacore sharding on v7x
                vmem_limit_bytes=vmem_limit,
            ),
            cost_estimate=cost,
        )(*operands)

    try:
        out_full = _run(True)
        jax.block_until_ready(out_full)   # surface lowering errors here (eager path)
    except Exception:
        # pl.Buffered(1) unsupported on this jax build -> default double-buffering.
        out_full = _run(False)

    return out_full[:batch, :out_dim]


# --------------------------------------------------------------------------- #
# Parameter init (PyTorch-default mimic) and pure-JAX reference.
# --------------------------------------------------------------------------- #
def init_params(key, input_dim, hidden_dim, out_dim):
    """Linear: U(-1/sqrt(fan_in), 1/sqrt(fan_in)); fc3 weight U(-0.003, 0.003)
    (out_fn == 'tanh' branch); LayerNorm gamma=1, beta=0. Weights stored [in, out]."""
    ks = jax.random.split(key, 6)

    def linear(kw, kb, fan_in, fan_out, w_range=None):
        bound = 1.0 / jnp.sqrt(fan_in)
        wb = bound if w_range is None else w_range
        w = jax.random.uniform(kw, (fan_in, fan_out), jnp.float32, -wb, wb)
        b = jax.random.uniform(kb, (fan_out,), jnp.float32, -bound, bound)
        return w, b.reshape(1, fan_out)

    w1, b1 = linear(ks[0], ks[1], input_dim, hidden_dim)
    w2, b2 = linear(ks[2], ks[3], hidden_dim, hidden_dim)
    w3, b3 = linear(ks[4], ks[5], hidden_dim, out_dim, w_range=0.003)

    g1 = jnp.ones((1, hidden_dim), jnp.float32)
    be1 = jnp.zeros((1, hidden_dim), jnp.float32)
    g2 = jnp.ones((1, hidden_dim), jnp.float32)
    be2 = jnp.zeros((1, hidden_dim), jnp.float32)
    return (w1, b1, g1, be1, w2, b2, g2, be2, w3, b3)


def reference_forward(x, params):
    (w1, b1, g1, be1, w2, b2, g2, be2, w3, b3) = params

    def ln(v, g, b):
        m = jnp.mean(v, axis=-1, keepdims=True)
        va = jnp.mean((v - m) ** 2, axis=-1, keepdims=True)
        return (v - m) * jax.lax.rsqrt(va + LN_EPS) * g + b

    h1 = jnp.maximum(ln(x @ w1 + b1, g1, be1), 0.0)
    h2 = jnp.maximum(ln(h1 @ w2 + b2, g2, be2), 0.0)
    return jnp.tanh(h2 @ w3 + b3)


if __name__ == "__main__":
    key = jax.random.PRNGKey(0)
    k_x, k_p = jax.random.split(key)

    batch, input_dim, hidden_dim, out_dim = 32, 16, 32, 4
    x = jax.random.normal(k_x, (batch, input_dim), jnp.float32)
    params = init_params(k_p, input_dim, hidden_dim, out_dim)
    prep = prepare_params(params)   # one-time bf16 cast + lane padding (hoisted)

    out = mlp_forward(x, prep)
    out = jax.block_until_ready(out)

    ref = reference_forward(x, params)
    assert out.shape == (batch, out_dim)
    # bf16 MXU inputs (f32 accumulate) -> relaxed tolerance vs f32 reference.
    assert jnp.allclose(out, ref, atol=2e-2, rtol=2e-2), "mismatch vs reference"

    print("KERNEL_OK")
</pallas_src>

<mosaic_0001>
module attributes {stable_mosaic.version = 11 : i64} {
  func.func @kernel(%arg0: i32, %arg1: memref<16x16xf32, #tpu.memory_space<vmem>>, %arg2: memref<16x128xbf16, #tpu.memory_space<vmem>>, %arg3: memref<1x128xf32, #tpu.memory_space<vmem>>, %arg4: memref<1x128xf32, #tpu.memory_space<vmem>>, %arg5: memref<1x128xf32, #tpu.memory_space<vmem>>, %arg6: memref<128x128xbf16, #tpu.memory_space<vmem>>, %arg7: memref<1x128xf32, #tpu.memory_space<vmem>>, %arg8: memref<1x128xf32, #tpu.memory_space<vmem>>, %arg9: memref<1x128xf32, #tpu.memory_space<vmem>>, %arg10: memref<128x128xbf16, #tpu.memory_space<vmem>>, %arg11: memref<1x128xf32, #tpu.memory_space<vmem>>, %arg12: memref<16x128xf32, #tpu.memory_space<vmem>>) attributes {dimension_semantics = [#tpu.dimension_semantics<parallel>], iteration_bounds = array<i64: 2>, scalar_prefetch = 0 : i64, scratch_operands = 0 : i64, tpu.core_type = #tpu.core_type<tc>, window_params = [{transform_indices = @transform_0, window_bounds = array<i64: 16, 16>}, {pipeline_mode = #tpu.pipeline_mode<synchronous>, transform_indices = @transform_1, window_bounds = array<i64: 16, 128>}, {pipeline_mode = #tpu.pipeline_mode<synchronous>, transform_indices = @transform_2, window_bounds = array<i64: 1, 128>}, {pipeline_mode = #tpu.pipeline_mode<synchronous>, transform_indices = @transform_3, window_bounds = array<i64: 1, 128>}, {pipeline_mode = #tpu.pipeline_mode<synchronous>, transform_indices = @transform_4, window_bounds = array<i64: 1, 128>}, {pipeline_mode = #tpu.pipeline_mode<synchronous>, transform_indices = @transform_5, window_bounds = array<i64: 128, 128>}, {pipeline_mode = #tpu.pipeline_mode<synchronous>, transform_indices = @transform_6, window_bounds = array<i64: 1, 128>}, {pipeline_mode = #tpu.pipeline_mode<synchronous>, transform_indices = @transform_7, window_bounds = array<i64: 1, 128>}, {pipeline_mode = #tpu.pipeline_mode<synchronous>, transform_indices = @transform_8, window_bounds = array<i64: 1, 128>}, {pipeline_mode = #tpu.pipeline_mode<synchronous>, transform_indices = @transform_9, window_bounds = array<i64: 128, 128>}, {pipeline_mode = #tpu.pipeline_mode<synchronous>, transform_indices = @transform_10, window_bounds = array<i64: 1, 128>}, {transform_indices = @transform_11, window_bounds = array<i64: 16, 128>}]} {
    %c0 = arith.constant 0 : index
    %c0_0 = arith.constant 0 : index
    %0 = vector.load %arg1[%c0, %c0_0] : memref<16x16xf32, #tpu.memory_space<vmem>>, vector<16x16xf32>
    %1 = arith.truncf %0 : vector<16x16xf32> to vector<16x16xbf16>
    %c0_1 = arith.constant 0 : index
    %c0_2 = arith.constant 0 : index
    %2 = vector.load %arg2[%c0_1, %c0_2] : memref<16x128xbf16, #tpu.memory_space<vmem>>, vector<16x128xbf16>
    %cst = arith.constant dense<0.000000e+00> : vector<16x128xf32>
    %3 = tpu.matmul %1, %2, %cst {dimension_numbers = #tpu.dot_dimension_numbers<[1], [0], [0], [1], [0, 0, 1, 1], [], []>} : vector<16x16xbf16>, vector<16x128xbf16>, vector<16x128xf32> -> vector<16x128xf32>
    %c0_3 = arith.constant 0 : index
    %c0_4 = arith.constant 0 : index
    %4 = vector.load %arg3[%c0_3, %c0_4] : memref<1x128xf32, #tpu.memory_space<vmem>>, vector<1x128xf32>
    %5 = vector.broadcast %4 : vector<1x128xf32> to vector<16x128xf32>
    %6 = arith.addf %3, %5 : vector<16x128xf32>
    %c0_5 = arith.constant 0 : index
    %c0_6 = arith.constant 0 : index
    %7 = vector.load %arg4[%c0_5, %c0_6] : memref<1x128xf32, #tpu.memory_space<vmem>>, vector<1x128xf32>
    %c0_7 = arith.constant 0 : index
    %c0_8 = arith.constant 0 : index
    %8 = vector.load %arg5[%c0_7, %c0_8] : memref<1x128xf32, #tpu.memory_space<vmem>>, vector<1x128xf32>
    %cst_9 = arith.constant dense<0.000000e+00> : vector<16xf32>
    %9 = vector.multi_reduction <add>, %6, %cst_9 [1] : vector<16x128xf32> to vector<16xf32>
    %10 = vector.shape_cast %9 : vector<16xf32> to vector<16x1xf32>
    %11 = arith.mulf %6, %6 : vector<16x128xf32>
    %cst_10 = arith.constant dense<0.000000e+00> : vector<16xf32>
    %12 = vector.multi_reduction <add>, %11, %cst_10 [1] : vector<16x128xf32> to vector<16xf32>
    %13 = vector.shape_cast %12 : vector<16xf32> to vector<16x1xf32>
    %cst_11 = arith.constant 3.125000e-02 : f32
    %14 = vector.broadcast %cst_11 : f32 to vector<16x1xf32>
    %15 = arith.mulf %10, %14 : vector<16x1xf32>
    %cst_12 = arith.constant 3.125000e-02 : f32
    %16 = vector.broadcast %cst_12 : f32 to vector<16x1xf32>
    %17 = arith.mulf %13, %16 : vector<16x1xf32>
    %18 = arith.mulf %15, %15 : vector<16x1xf32>
    %19 = arith.subf %17, %18 : vector<16x1xf32>
    %cst_13 = arith.constant 9.99999974E-6 : f32
    %20 = vector.broadcast %cst_13 : f32 to vector<16x1xf32>
    %21 = arith.addf %19, %20 : vector<16x1xf32>
    %22 = math.rsqrt %21 : vector<16x1xf32>
    %23 = vector.broadcast %15 : vector<16x1xf32> to vector<16x128xf32>
    %24 = arith.subf %6, %23 : vector<16x128xf32>
    %25 = vector.broadcast %22 : vector<16x1xf32> to vector<16x128xf32>
    %26 = arith.mulf %24, %25 : vector<16x128xf32>
    %27 = vector.broadcast %7 : vector<1x128xf32> to vector<16x128xf32>
    %28 = arith.mulf %26, %27 : vector<16x128xf32>
    %29 = vector.broadcast %8 : vector<1x128xf32> to vector<16x128xf32>
    %30 = arith.addf %28, %29 : vector<16x128xf32>
    %cst_14 = arith.constant 0.000000e+00 : f32
    %31 = vector.broadcast %cst_14 : f32 to vector<16x128xf32>
    %32 = arith.maximumf %30, %31 : vector<16x128xf32>
    %33 = arith.truncf %32 : vector<16x128xf32> to vector<16x128xbf16>
    %c0_15 = arith.constant 0 : index
    %c0_16 = arith.constant 0 : index
    %34 = vector.load %arg6[%c0_15, %c0_16] : memref<128x128xbf16, #tpu.memory_space<vmem>>, vector<128x128xbf16>
    %cst_17 = arith.constant dense<0.000000e+00> : vector<16x128xf32>
    %35 = tpu.matmul %33, %34, %cst_17 {dimension_numbers = #tpu.dot_dimension_numbers<[1], [0], [0], [1], [0, 0, 1, 1], [], []>} : vector<16x128xbf16>, vector<128x128xbf16>, vector<16x128xf32> -> vector<16x128xf32>
    %c0_18 = arith.constant 0 : index
    %c0_19 = arith.constant 0 : index
    %36 = vector.load %arg7[%c0_18, %c0_19] : memref<1x128xf32, #tpu.memory_space<vmem>>, vector<1x128xf32>
    %37 = vector.broadcast %36 : vector<1x128xf32> to vector<16x128xf32>
    %38 = arith.addf %35, %37 : vector<16x128xf32>
    %c0_20 = arith.constant 0 : index
    %c0_21 = arith.constant 0 : index
    %39 = vector.load %arg8[%c0_20, %c0_21] : memref<1x128xf32, #tpu.memory_space<vmem>>, vector<1x128xf32>
    %c0_22 = arith.constant 0 : index
    %c0_23 = arith.constant 0 : index
    %40 = vector.load %arg9[%c0_22, %c0_23] : memref<1x128xf32, #tpu.memory_space<vmem>>, vector<1x128xf32>
    %cst_24 = arith.constant dense<0.000000e+00> : vector<16xf32>
    %41 = vector.multi_reduction <add>, %38, %cst_24 [1] : vector<16x128xf32> to vector<16xf32>
    %42 = vector.shape_cast %41 : vector<16xf32> to vector<16x1xf32>
    %43 = arith.mulf %38, %38 : vector<16x128xf32>
    %cst_25 = arith.constant dense<0.000000e+00> : vector<16xf32>
    %44 = vector.multi_reduction <add>, %43, %cst_25 [1] : vector<16x128xf32> to vector<16xf32>
    %45 = vector.shape_cast %44 : vector<16xf32> to vector<16x1xf32>
    %cst_26 = arith.constant 3.125000e-02 : f32
    %46 = vector.broadcast %cst_26 : f32 to vector<16x1xf32>
    %47 = arith.mulf %42, %46 : vector<16x1xf32>
    %cst_27 = arith.constant 3.125000e-02 : f32
    %48 = vector.broadcast %cst_27 : f32 to vector<16x1xf32>
    %49 = arith.mulf %45, %48 : vector<16x1xf32>
    %50 = arith.mulf %47, %47 : vector<16x1xf32>
    %51 = arith.subf %49, %50 : vector<16x1xf32>
    %cst_28 = arith.constant 9.99999974E-6 : f32
    %52 = vector.broadcast %cst_28 : f32 to vector<16x1xf32>
    %53 = arith.addf %51, %52 : vector<16x1xf32>
    %54 = math.rsqrt %53 : vector<16x1xf32>
    %55 = vector.broadcast %47 : vector<16x1xf32> to vector<16x128xf32>
    %56 = arith.subf %38, %55 : vector<16x128xf32>
    %57 = vector.broadcast %54 : vector<16x1xf32> to vector<16x128xf32>
    %58 = arith.mulf %56, %57 : vector<16x128xf32>
    %59 = vector.broadcast %39 : vector<1x128xf32> to vector<16x128xf32>
    %60 = arith.mulf %58, %59 : vector<16x128xf32>
    %61 = vector.broadcast %40 : vector<1x128xf32> to vector<16x128xf32>
    %62 = arith.addf %60, %61 : vector<16x128xf32>
    %cst_29 = arith.constant 0.000000e+00 : f32
    %63 = vector.broadcast %cst_29 : f32 to vector<16x128xf32>
    %64 = arith.maximumf %62, %63 : vector<16x128xf32>
    %65 = arith.truncf %64 : vector<16x128xf32> to vector<16x128xbf16>
    %c0_30 = arith.constant 0 : index
    %c0_31 = arith.constant 0 : index
    %66 = vector.load %arg10[%c0_30, %c0_31] : memref<128x128xbf16, #tpu.memory_space<vmem>>, vector<128x128xbf16>
    %cst_32 = arith.constant dense<0.000000e+00> : vector<16x128xf32>
    %67 = tpu.matmul %65, %66, %cst_32 {dimension_numbers = #tpu.dot_dimension_numbers<[1], [0], [0], [1], [0, 0, 1, 1], [], []>} : vector<16x128xbf16>, vector<128x128xbf16>, vector<16x128xf32> -> vector<16x128xf32>
    %c0_33 = arith.constant 0 : index
    %c0_34 = arith.constant 0 : index
    %68 = vector.load %arg11[%c0_33, %c0_34] : memref<1x128xf32, #tpu.memory_space<vmem>>, vector<1x128xf32>
    %69 = vector.broadcast %68 : vector<1x128xf32> to vector<16x128xf32>
    %70 = arith.addf %67, %69 : vector<16x128xf32>
    %71 = math.tanh %70 : vector<16x128xf32>
    %c0_35 = arith.constant 0 : index
    %c0_36 = arith.constant 0 : index
    %72 = vector.load %arg12[%c0_35, %c0_36] : memref<16x128xf32, #tpu.memory_space<vmem>>, vector<16x128xf32>
    tpu.vector_store %arg12[%c0_35, %c0_36], %71 {strides = array<i32>} : memref<16x128xf32, #tpu.memory_space<vmem>>, vector<16x128xf32>,
    return
  }
  func.func @transform_0(%arg0: i32) -> (i32, i32) {
    %c0_i32 = arith.constant 0 : i32
    %c0_i32_0 = arith.constant 0 : i32
    return %arg0, %c0_i32 : i32, i32
  }
  func.func @transform_1(%arg0: i32) -> (i32, i32) {
    %c0_i32 = arith.constant 0 : i32
    %c0_i32_0 = arith.constant 0 : i32
    %c0_i32_1 = arith.constant 0 : i32
    return %c0_i32, %c0_i32_0 : i32, i32
  }
  func.func @transform_2(%arg0: i32) -> (i32, i32) {
    %c0_i32 = arith.constant 0 : i32
    %c0_i32_0 = arith.constant 0 : i32
    %c0_i32_1 = arith.constant 0 : i32
    return %c0_i32, %c0_i32_0 : i32, i32
  }
  func.func @transform_3(%arg0: i32) -> (i32, i32) {
    %c0_i32 = arith.constant 0 : i32
    %c0_i32_0 = arith.constant 0 : i32
    %c0_i32_1 = arith.constant 0 : i32
    return %c0_i32, %c0_i32_0 : i32, i32
  }
  func.func @transform_4(%arg0: i32) -> (i32, i32) {
    %c0_i32 = arith.constant 0 : i32
    %c0_i32_0 = arith.constant 0 : i32
    %c0_i32_1 = arith.constant 0 : i32
    return %c0_i32, %c0_i32_0 : i32, i32
  }
  func.func @transform_5(%arg0: i32) -> (i32, i32) {
    %c0_i32 = arith.constant 0 : i32
    %c0_i32_0 = arith.constant 0 : i32
    %c0_i32_1 = arith.constant 0 : i32
    return %c0_i32, %c0_i32_0 : i32, i32
  }
  func.func @transform_6(%arg0: i32) -> (i32, i32) {
    %c0_i32 = arith.constant 0 : i32
    %c0_i32_0 = arith.constant 0 : i32
    %c0_i32_1 = arith.constant 0 : i32
    return %c0_i32, %c0_i32_0 : i32, i32
  }
  func.func @transform_7(%arg0: i32) -> (i32, i32) {
    %c0_i32 = arith.constant 0 : i32
    %c0_i32_0 = arith.constant 0 : i32
    %c0_i32_1 = arith.constant 0 : i32
    return %c0_i32, %c0_i32_0 : i32, i32
  }
  func.func @transform_8(%arg0: i32) -> (i32, i32) {
    %c0_i32 = arith.constant 0 : i32
    %c0_i32_0 = arith.constant 0 : i32
    %c0_i32_1 = arith.constant 0 : i32
    return %c0_i32, %c0_i32_0 : i32, i32
  }
  func.func @transform_9(%arg0: i32) -> (i32, i32) {
    %c0_i32 = arith.constant 0 : i32
    %c0_i32_0 = arith.constant 0 : i32
    %c0_i32_1 = arith.constant 0 : i32
    return %c0_i32, %c0_i32_0 : i32, i32
  }
  func.func @transform_10(%arg0: i32) -> (i32, i32) {
    %c0_i32 = arith.constant 0 : i32
    %c0_i32_0 = arith.constant 0 : i32
    %c0_i32_1 = arith.constant 0 : i32
    return %c0_i32, %c0_i32_0 : i32, i32
  }
  func.func @transform_11(%arg0: i32) -> (i32, i32) {
    %c0_i32 = arith.constant 0 : i32
    %c0_i32_0 = arith.constant 0 : i32
    return %arg0, %c0_i32 : i32, i32
  }
}

module attributes {stable_mosaic.version = 11 : i64} {
  func.func @kernel(%arg0: i32, %arg1: memref<16x16xf32, #tpu.memory_space<vmem>>, %arg2: memref<16x128xbf16, #tpu.memory_space<vmem>>, %arg3: memref<1x128xf32, #tpu.memory_space<vmem>>, %arg4: memref<1x128xf32, #tpu.memory_space<vmem>>, %arg5: memref<1x128xf32, #tpu.memory_space<vmem>>, %arg6: memref<128x128xbf16, #tpu.memory_space<vmem>>, %arg7: memref<1x128xf32, #tpu.memory_space<vmem>>, %arg8: memref<1x128xf32, #tpu.memory_space<vmem>>, %arg9: memref<1x128xf32, #tpu.memory_space<vmem>>, %arg10: memref<128x128xbf16, #tpu.memory_space<vmem>>, %arg11: memref<1x128xf32, #tpu.memory_space<vmem>>, %arg12: memref<16x128xf32, #tpu.memory_space<vmem>>) attributes {dimension_semantics = [#tpu.dimension_semantics<parallel>], iteration_bounds = array<i64: 2>, scalar_prefetch = 0 : i64, scratch_operands = 0 : i64, tpu.core_type = #tpu.core_type<tc>, window_params = [{transform_indices = @transform_0, window_bounds = array<i64: 16, 16>}, {pipeline_mode = #tpu.pipeline_mode<synchronous>, transform_indices = @transform_1, window_bounds = array<i64: 16, 128>}, {pipeline_mode = #tpu.pipeline_mode<synchronous>, transform_indices = @transform_2, window_bounds = array<i64: 1, 128>}, {pipeline_mode = #tpu.pipeline_mode<synchronous>, transform_indices = @transform_3, window_bounds = array<i64: 1, 128>}, {pipeline_mode = #tpu.pipeline_mode<synchronous>, transform_indices = @transform_4, window_bounds = array<i64: 1, 128>}, {pipeline_mode = #tpu.pipeline_mode<synchronous>, transform_indices = @transform_5, window_bounds = array<i64: 128, 128>}, {pipeline_mode = #tpu.pipeline_mode<synchronous>, transform_indices = @transform_6, window_bounds = array<i64: 1, 128>}, {pipeline_mode = #tpu.pipeline_mode<synchronous>, transform_indices = @transform_7, window_bounds = array<i64: 1, 128>}, {pipeline_mode = #tpu.pipeline_mode<synchronous>, transform_indices = @transform_8, window_bounds = array<i64: 1, 128>}, {pipeline_mode = #tpu.pipeline_mode<synchronous>, transform_indices = @transform_9, window_bounds = array<i64: 128, 128>}, {pipeline_mode = #tpu.pipeline_mode<synchronous>, transform_indices = @transform_10, window_bounds = array<i64: 1, 128>}, {transform_indices = @transform_11, window_bounds = array<i64: 16, 128>}]} {
    %c0 = arith.constant 0 : index
    %c0_0 = arith.constant 0 : index
    %0 = vector.load %arg1[%c0, %c0_0] : memref<16x16xf32, #tpu.memory_space<vmem>>, vector<16x16xf32>
    %1 = arith.truncf %0 : vector<16x16xf32> to vector<16x16xbf16>
    %c0_1 = arith.constant 0 : index
    %c0_2 = arith.constant 0 : index
    %2 = vector.load %arg2[%c0_1, %c0_2] : memref<16x128xbf16, #tpu.memory_space<vmem>>, vector<16x128xbf16>
    %cst = arith.constant dense<0.000000e+00> : vector<16x128xf32>
    %3 = tpu.matmul %1, %2, %cst {dimension_numbers = #tpu.dot_dimension_numbers<[1], [0], [0], [1], [0, 0, 1, 1], [], []>} : vector<16x16xbf16>, vector<16x128xbf16>, vector<16x128xf32> -> vector<16x128xf32>
    %c0_3 = arith.constant 0 : index
    %c0_4 = arith.constant 0 : index
    %4 = vector.load %arg3[%c0_3, %c0_4] : memref<1x128xf32, #tpu.memory_space<vmem>>, vector<1x128xf32>
    %5 = vector.broadcast %4 : vector<1x128xf32> to vector<16x128xf32>
    %6 = arith.addf %3, %5 : vector<16x128xf32>
    %c0_5 = arith.constant 0 : index
    %c0_6 = arith.constant 0 : index
    %7 = vector.load %arg4[%c0_5, %c0_6] : memref<1x128xf32, #tpu.memory_space<vmem>>, vector<1x128xf32>
    %c0_7 = arith.constant 0 : index
    %c0_8 = arith.constant 0 : index
    %8 = vector.load %arg5[%c0_7, %c0_8] : memref<1x128xf32, #tpu.memory_space<vmem>>, vector<1x128xf32>
    %cst_9 = arith.constant dense<0.000000e+00> : vector<16xf32>
    %9 = vector.multi_reduction <add>, %6, %cst_9 [1] : vector<16x128xf32> to vector<16xf32>
    %10 = vector.shape_cast %9 : vector<16xf32> to vector<16x1xf32>
    %11 = arith.mulf %6, %6 : vector<16x128xf32>
    %cst_10 = arith.constant dense<0.000000e+00> : vector<16xf32>
    %12 = vector.multi_reduction <add>, %11, %cst_10 [1] : vector<16x128xf32> to vector<16xf32>
    %13 = vector.shape_cast %12 : vector<16xf32> to vector<16x1xf32>
    %cst_11 = arith.constant 3.125000e-02 : f32
    %14 = vector.broadcast %cst_11 : f32 to vector<16x1xf32>
    %15 = arith.mulf %10, %14 : vector<16x1xf32>
    %cst_12 = arith.constant 3.125000e-02 : f32
    %16 = vector.broadcast %cst_12 : f32 to vector<16x1xf32>
    %17 = arith.mulf %13, %16 : vector<16x1xf32>
    %18 = arith.mulf %15, %15 : vector<16x1xf32>
    %19 = arith.subf %17, %18 : vector<16x1xf32>
    %cst_13 = arith.constant 9.99999974E-6 : f32
    %20 = vector.broadcast %cst_13 : f32 to vector<16x1xf32>
    %21 = arith.addf %19, %20 : vector<16x1xf32>
    %22 = math.rsqrt %21 : vector<16x1xf32>
    %23 = vector.broadcast %15 : vector<16x1xf32> to vector<16x128xf32>
    %24 = arith.subf %6, %23 : vector<16x128xf32>
    %25 = vector.broadcast %22 : vector<16x1xf32> to vector<16x128xf32>
    %26 = arith.mulf %24, %25 : vector<16x128xf32>
    %27 = vector.broadcast %7 : vector<1x128xf32> to vector<16x128xf32>
    %28 = arith.mulf %26, %27 : vector<16x128xf32>
    %29 = vector.broadcast %8 : vector<1x128xf32> to vector<16x128xf32>
    %30 = arith.addf %28, %29 : vector<16x128xf32>
    %cst_14 = arith.constant 0.000000e+00 : f32
    %31 = vector.broadcast %cst_14 : f32 to vector<16x128xf32>
    %32 = arith.maximumf %30, %31 : vector<16x128xf32>
    %33 = arith.truncf %32 : vector<16x128xf32> to vector<16x128xbf16>
    %c0_15 = arith.constant 0 : index
    %c0_16 = arith.constant 0 : index
    %34 = vector.load %arg6[%c0_15, %c0_16] : memref<128x128xbf16, #tpu.memory_space<vmem>>, vector<128x128xbf16>
    %cst_17 = arith.constant dense<0.000000e+00> : vector<16x128xf32>
    %35 = tpu.matmul %33, %34, %cst_17 {dimension_numbers = #tpu.dot_dimension_numbers<[1], [0], [0], [1], [0, 0, 1, 1], [], []>} : vector<16x128xbf16>, vector<128x128xbf16>, vector<16x128xf32> -> vector<16x128xf32>
    %c0_18 = arith.constant 0 : index
    %c0_19 = arith.constant 0 : index
    %36 = vector.load %arg7[%c0_18, %c0_19] : memref<1x128xf32, #tpu.memory_space<vmem>>, vector<1x128xf32>
    %37 = vector.broadcast %36 : vector<1x128xf32> to vector<16x128xf32>
    %38 = arith.addf %35, %37 : vector<16x128xf32>
    %c0_20 = arith.constant 0 : index
    %c0_21 = arith.constant 0 : index
    %39 = vector.load %arg8[%c0_20, %c0_21] : memref<1x128xf32, #tpu.memory_space<vmem>>, vector<1x128xf32>
    %c0_22 = arith.constant 0 : index
    %c0_23 = arith.constant 0 : index
    %40 = vector.load %arg9[%c0_22, %c0_23] : memref<1x128xf32, #tpu.memory_space<vmem>>, vector<1x128xf32>
    %cst_24 = arith.constant dense<0.000000e+00> : vector<16xf32>
    %41 = vector.multi_reduction <add>, %38, %cst_24 [1] : vector<16x128xf32> to vector<16xf32>
    %42 = vector.shape_cast %41 : vector<16xf32> to vector<16x1xf32>
    %43 = arith.mulf %38, %38 : vector<16x128xf32>
    %cst_25 = arith.constant dense<0.000000e+00> : vector<16xf32>
    %44 = vector.multi_reduction <add>, %43, %cst_25 [1] : vector<16x128xf32> to vector<16xf32>
    %45 = vector.shape_cast %44 : vector<16xf32> to vector<16x1xf32>
    %cst_26 = arith.constant 3.125000e-02 : f32
    %46 = vector.broadcast %cst_26 : f32 to vector<16x1xf32>
    %47 = arith.mulf %42, %46 : vector<16x1xf32>
    %cst_27 = arith.constant 3.125000e-02 : f32
    %48 = vector.broadcast %cst_27 : f32 to vector<16x1xf32>
    %49 = arith.mulf %45, %48 : vector<16x1xf32>
    %50 = arith.mulf %47, %47 : vector<16x1xf32>
    %51 = arith.subf %49, %50 : vector<16x1xf32>
    %cst_28 = arith.constant 9.99999974E-6 : f32
    %52 = vector.broadcast %cst_28 : f32 to vector<16x1xf32>
    %53 = arith.addf %51, %52 : vector<16x1xf32>
    %54 = math.rsqrt %53 : vector<16x1xf32>
    %55 = vector.broadcast %47 : vector<16x1xf32> to vector<16x128xf32>
    %56 = arith.subf %38, %55 : vector<16x128xf32>
    %57 = vector.broadcast %54 : vector<16x1xf32> to vector<16x128xf32>
    %58 = arith.mulf %56, %57 : vector<16x128xf32>
    %59 = vector.broadcast %39 : vector<1x128xf32> to vector<16x128xf32>
    %60 = arith.mulf %58, %59 : vector<16x128xf32>
    %61 = vector.broadcast %40 : vector<1x128xf32> to vector<16x128xf32>
    %62 = arith.addf %60, %61 : vector<16x128xf32>
    %cst_29 = arith.constant 0.000000e+00 : f32
    %63 = vector.broadcast %cst_29 : f32 to vector<16x128xf32>
    %64 = arith.maximumf %62, %63 : vector<16x128xf32>
    %65 = arith.truncf %64 : vector<16x128xf32> to vector<16x128xbf16>
    %c0_30 = arith.constant 0 : index
    %c0_31 = arith.constant 0 : index
    %66 = vector.load %arg10[%c0_30, %c0_31] : memref<128x128xbf16, #tpu.memory_space<vmem>>, vector<128x128xbf16>
    %cst_32 = arith.constant dense<0.000000e+00> : vector<16x128xf32>
    %67 = tpu.matmul %65, %66, %cst_32 {dimension_numbers = #tpu.dot_dimension_numbers<[1], [0], [0], [1], [0, 0, 1, 1], [], []>} : vector<16x128xbf16>, vector<128x128xbf16>, vector<16x128xf32> -> vector<16x128xf32>
    %c0_33 = arith.constant 0 : index
    %c0_34 = arith.constant 0 : index
    %68 = vector.load %arg11[%c0_33, %c0_34] : memref<1x128xf32, #tpu.memory_space<vmem>>, vector<1x128xf32>
    %69 = vector.broadcast %68 : vector<1x128xf32> to vector<16x128xf32>
    %70 = arith.addf %67, %69 : vector<16x128xf32>
    %71 = math.tanh %70 : vector<16x128xf32>
    %c0_35 = arith.constant 0 : index
    %c0_36 = arith.constant 0 : index
    %72 = vector.load %arg12[%c0_35, %c0_36] : memref<16x128xf32, #tpu.memory_space<vmem>>, vector<16x128xf32>
    tpu.vector_store %arg12[%c0_35, %c0_36], %71 {strides = array<i32>} : memref<16x128xf32, #tpu.memory_space<vmem>>, vector<16x128xf32>,
    return
  }
  func.func @transform_0(%arg0: i32) -> (i32, i32) {
    %c0_i32 = arith.constant 0 : i32
    %c0_i32_0 = arith.constant 0 : i32
    return %arg0, %c0_i32 : i32, i32
  }
  func.func @transform_1(%arg0: i32) -> (i32, i32) {
    %c0_i32 = arith.constant 0 : i32
    %c0_i32_0 = arith.constant 0 : i32
    %c0_i32_1 = arith.constant 0 : i32
    return %c0_i32, %c0_i32_0 : i32, i32
  }
  func.func @transform_2(%arg0: i32) -> (i32, i32) {
    %c0_i32 = arith.constant 0 : i32
    %c0_i32_0 = arith.constant 0 : i32
    %c0_i32_1 = arith.constant 0 : i32
    return %c0_i32, %c0_i32_0 : i32, i32
  }
  func.func @transform_3(%arg0: i32) -> (i32, i32) {
    %c0_i32 = arith.constant 0 : i32
    %c0_i32_0 = arith.constant 0 : i32
    %c0_i32_1 = arith.constant 0 : i32
    return %c0_i32, %c0_i32_0 : i32, i32
  }
  func.func @transform_4(%arg0: i32) -> (i32, i32) {
    %c0_i32 = arith.constant 0 : i32
    %c0_i32_0 = arith.constant 0 : i32
    %c0_i32_1 = arith.constant 0 : i32
    return %c0_i32, %c0_i32_0 : i32, i32
  }
  func.func @transform_5(%arg0: i32) -> (i32, i32) {
    %c0_i32 = arith.constant 0 : i32
    %c0_i32_0 = arith.constant 0 : i32
    %c0_i32_1 = arith.constant 0 : i32
    return %c0_i32, %c0_i32_0 : i32, i32
  }
  func.func @transform_6(%arg0: i32) -> (i32, i32) {
    %c0_i32 = arith.constant 0 : i32
    %c0_i32_0 = arith.constant 0 : i32
    %c0_i32_1 = arith.constant 0 : i32
    return %c0_i32, %c0_i32_0 : i32, i32
  }
  func.func @transform_7(%arg0: i32) -> (i32, i32) {
    %c0_i32 = arith.constant 0 : i32
    %c0_i32_0 = arith.constant 0 : i32
    %c0_i32_1 = arith.constant 0 : i32
    return %c0_i32, %c0_i32_0 : i32, i32
  }
  func.func @transform_8(%arg0: i32) -> (i32, i32) {
    %c0_i32 = arith.constant 0 : i32
    %c0_i32_0 = arith.constant 0 : i32
    %c0_i32_1 = arith.constant 0 : i32
    return %c0_i32, %c0_i32_0 : i32, i32
  }
  func.func @transform_9(%arg0: i32) -> (i32, i32) {
    %c0_i32 = arith.constant 0 : i32
    %c0_i32_0 = arith.constant 0 : i32
    %c0_i32_1 = arith.constant 0 : i32
    return %c0_i32, %c0_i32_0 : i32, i32
  }
  func.func @transform_10(%arg0: i32) -> (i32, i32) {
    %c0_i32 = arith.constant 0 : i32
    %c0_i32_0 = arith.constant 0 : i32
    %c0_i32_1 = arith.constant 0 : i32
    return %c0_i32, %c0_i32_0 : i32, i32
  }
  func.func @transform_11(%arg0: i32) -> (i32, i32) {
    %c0_i32 = arith.constant 0 : i32
    %c0_i32_0 = arith.constant 0 : i32
    return %arg0, %c0_i32 : i32, i32
  }
}

</mosaic_0001>

<bundles_post_ra>
// kernel: tpu_custom_call.1
= control target key start
LH: loop header
LB: loop body
LE: loop exit
PB: predicated region body
PF: predicated region fallthrough
CT: control target
= control target key end

     0   :  { %s1624_s0 = inlined_call_operand.vmem [shape: f32[32,16], index: 0, kind: input, shape index: {}]   ;;  %s1625_s1 = inlined_call_operand.hbm [shape: bf16[16,128], index: 1, kind: input, shape index: {}]   ;;  %s1626_s2 = inlined_call_operand.vmem [shape: f32[1,128], index: 2, kind: input, shape index: {}]   ;;  %s1627_s3 = inlined_call_operand.vmem [shape: f32[1,128], index: 3, kind: input, shape index: {}]   ;;  %s1628_s4 = inlined_call_operand.hbm [shape: f32[1,128], index: 4, kind: input, shape index: {}]   ;;  %s1629_s5 = inlined_call_operand.vmem [shape: bf16[128,128], index: 5, kind: input, shape index: {}]   ;;  %s1630_s6 = inlined_call_operand.vmem [shape: f32[1,128], index: 6, kind: input, shape index: {}]   ;;  %s1631_s7 = inlined_call_operand.vmem [shape: f32[1,128], index: 7, kind: input, shape index: {}]   ;;  %s1632_s8 = inlined_call_operand.vmem [shape: f32[1,128], index: 8, kind: input, shape index: {}]   ;;  %s1633_s9 = inlined_call_operand.hbm [shape: bf16[128,128], index: 9, kind: input, shape index: {}]   ;;  %s1634_s10 = inlined_call_operand.vmem [shape: f32[1,128], index: 10, kind: input, shape index: {}]   ;;  %s1635_s11 = inlined_call_operand.hbm [shape: f32[32,128], index: 11, kind: output, shape index: {}]  }
   0x1   :  { %1644 = sst [smem:[#allocation17_spill]] %s1628_s4 }
   0x2   :  { %16 = vsyncpa [#allocation3], 0 }
   0x3   :  { %17 = vsyncpa [#allocation6], 0 }
   0x4   :  { %18 = vsyncpa [#allocation4], 0 }
   0x5   :  { %20 = vsyncpa [#allocation4 + $0x1], 0  ;;  %s1364_s17 = smov 0   ;;  %s1366_s18 = smov 0  }
   0x6   :  { %s1368_s19 = smov 0   ;;  %s1370_s20 = smov 0  }
   0x7 LB: > { %1645 = sst [smem:[#allocation12_spill]] %s1280_s17  ;;  %s1385_s21 = sadd.s32 4294967295, %s1292_s20   ;;  %s1292_s20 = sphi %s1370_s20, %s1665_s20   ;;  %s1288_s19 = sphi %s1368_s19, %s1670_s19   ;;  %s1284_s18 = sphi %s1366_s18, %s1669_s18   ;;  %s1280_s17 = sphi %s1364_s17, %s1668_s17  }
   0x8   : > { %1646 = sst [smem:[#allocation13_spill]] %s1288_s19  ;;  %s923_s22 = sadd.s32 4294967294, %s1292_s20  }
   0x9   : > { %s1389_s23 = sadd.s32 1, %s1292_s20   ;;  %s269_s24 = sadd.s32 1, %s1288_s19 }
   0xa   : > { %1647 = sst [smem:[#allocation14_spill]] %s1389_s23  ;;  %s266_s25 = ssub.s32 %s1292_s20, %s1389_s23 }
   0xb   : > { %p279_p0 = scmp.ne.s32.totalorder %s1288_s19, %s1284_s18  ;;  %p267_p1 = scmp.eq.s32.totalorder %s266_s25, 0 }
   0xc   : > { %p280_p2 = scmp.eq.s32.totalorder %s1385_s21, 1  ;;  %p285_p3 = scmp.ne.s32.totalorder %s1284_s18, %s1280_s17 }
   0xd   : > { %p286_p4 = scmp.eq.s32.totalorder %s923_s22, 1  ;;  %p924_p7 = scmp.ge.s32.totalorder %s1292_s20, 1 }
   0xe   : > { %s1400_s26 = scalar_select %p267_p1, %s1288_s19, %s269_s24  }
   0xf   : > { %p1402_p5 = por %p280_p2, %p279_p0  ;;  %p1406_p6 = por %p286_p4, %p285_p3 }
  0x10   : > { %1648 = sst [smem:[#allocation15_spill]] %s1400_s26  ;;  %p293_p8 = scmp.lt.s32.totalorder %s1292_s20, 3 }
  0x11   : > { %s1649_s27 = scalar_select %p1402_p5, 1, 0 }
  0x12   : > { %s1650_s28 = scalar_select %p1406_p6, 1, 0 }
  0x13   : > { %p1639_p9 = scmp.eq.s32.totalorder %s1385_s21, 0  ;;  %p1413_p10 = pnand %p924_p7, %p293_p8 }
  0x14   : > { %1651 = sst [smem:[#allocation16_spill]] %s1650_s28  ;;  %s1294_s30 = smov [#allocation5]  }
  0x15   : > { %s1652_s29 = scalar_select %p1413_p10, 1, 0 }
  0x16   : > { %s325_s12 = sshll.u32 %s1294_s30, 4  ;;  %p1047_p11 = pneg %p1413_p10  ;;  %s326_s12 = int_to_ptr.vmem [resolvable:$true] %s325_s12 }
  0x17   : > { %s1295_s13 = smov [#allocation2]   ;;  %s1296_s16 = smov [#allocation7]  }
  0x18   : > { %s305_s14 = sshll.u32 %s1295_s13, 4  ;;  %p1421_p12 = pnand %p1639_p9, %p1047_p11  ;;  %s1425_s14 = int_to_ptr.vmem [resolvable:$true] %s305_s14 }
  0x19   : > { %s1427_s22 = sshll.u32 %s1296_s16, 4  ;;  %s1654_s4 = sld [smem:[#allocation17_spill]]  ;;  %s348_s22 = int_to_ptr.vmem [resolvable:$true] %s1427_s22 }
  0x1a   : > { %p1437_p0 = pneg %p1421_p12 }
  0x1f   : > { %s1138_s30 = scalar_lea.hbm %s1654_s4, 16 }
  0x20   : > { %p1139_p13 = scmp.ne.s32.totalorder %s1654_s4, %s1138_s30  ;;  %p1145_p3 = scmp.lt.u32.totalorder %s1138_s30, %s1654_s4 }
  0x22   : > { %p1141_p1 = pnand %p1437_p0, %p1139_p13 }
  0x24   : > { %p1142_p2 = pneg %p1141_p1 }
  0x26   : > { %p1147_p4 = pnand %p1145_p3, %p1142_p2 }
  0x28   : > { %1150 = shalt.err (!%p1147_p4)
}
  0x29   : > { %s1151_s24 = scalar_lea.vmem %s326_s12, 16  ;;  %s1158_s19 = scalar_lea.vmem %s326_s12, 32 }
  0x2a   : > { %p1152_p7 = scmp.ne.s32.totalorder %s326_s12, %s1151_s24  ;;  %p1159_p9 = scmp.lt.s32.totalorder %s326_s12, %s326_s12 }
  0x2b   : > { %p1160_p6 = scmp.lt.s32.totalorder %s1158_s19, %s1151_s24 }
  0x2c   : > { %p1154_p8 = pnand %p1152_p7, %p1437_p0 }
  0x2d   : > { %p1161_p5 = por %p1160_p6, %p1159_p9 }
  0x2e   : > { %p1155_p11 = pneg %p1154_p8 }
  0x30   : > { %p1162_p10 = pnand %p1161_p5, %p1155_p11 }
  0x32   : > { %1165 = shalt.err (!%p1162_p10)
}
  0x33   : > { %1053 = dma.hbm_to_vmem [thread:$0]  (!%p1421_p12), %s1654_s4, 16, %s326_s12, [#allocation6]  }
  0x34   : > { %s1166_s16 = scalar_lea.hbm %s1625_s1, 128 }
  0x35   : > { %p1167_p13 = scmp.ne.s32.totalorder %s1625_s1, %s1166_s16  ;;  %p1173_p5 = scmp.lt.u32.totalorder %s1166_s16, %s1625_s1 }
  0x37   : > { %p1169_p1 = pnand %p1167_p13, %p1437_p0 }
  0x39   : > { %p1170_p6 = pneg %p1169_p1 }
  0x3b   : > { %p1175_p9 = pnand %p1173_p5, %p1170_p6 }
  0x3d   : > { %1178 = shalt.err (!%p1175_p9)
}
  0x3e   : > { %s1179_s12 = scalar_lea.vmem %s1425_s14, 128  ;;  %p1187_p4 = scmp.lt.s32.totalorder %s1425_s14, %s1425_s14 }
  0x3f   : > { %p1180_p10 = scmp.ne.s32.totalorder %s1425_s14, %s1179_s12  ;;  %p1188_p7 = scmp.lt.s32.totalorder %s1179_s12, %s1179_s12 }
  0x41   : > { %p1182_p2 = pnand %p1180_p10, %p1437_p0  ;;  %p1189_p8 = por %p1188_p7, %p1187_p4 }
  0x43   : > { %p1183_p3 = pneg %p1182_p2 }
  0x45   : > { %p1190_p11 = pnand %p1189_p8, %p1183_p3 }
  0x47   : > { %1193 = shalt.err (!%p1190_p11)
}
  0x48   : > { %s1297_s17 = smov 64   ;;  %s1298_s28 = smov 4  }
  0x49   : > { %1050 = dma.hbm_to_vmem [thread:$0]  (!%p1421_p12), %s1625_s1, 128, %s1425_s14, [#allocation3], %s1297_s17, %s1297_s17, %s1298_s28  }
  0x4a   : > { %s1194_s16 = scalar_lea.hbm %s1633_s9, 1024 }
  0x4b   : > { %p1195_p13 = scmp.ne.s32.totalorder %s1633_s9, %s1194_s16  ;;  %p1201_p5 = scmp.lt.u32.totalorder %s1194_s16, %s1633_s9 }
  0x4d   : > { %p1197_p1 = pnand %p1195_p13, %p1437_p0 }
  0x4f   : > { %p1198_p6 = pneg %p1197_p1 }
  0x51   : > { %p1203_p9 = pnand %p1201_p5, %p1198_p6 }
  0x53   : > { %1206 = shalt.err (!%p1203_p9)
}
  0x54   : > { %s1207_s26 = scalar_lea.vmem %s348_s22, 1024  ;;  %p1215_p4 = scmp.lt.s32.totalorder %s348_s22, %s348_s22 }
  0x55   : > { %p1208_p10 = scmp.ne.s32.totalorder %s348_s22, %s1207_s26  ;;  %p1216_p7 = scmp.lt.s32.totalorder %s1207_s26, %s1207_s26 }
  0x57   : > { %p1210_p2 = pnand %p1208_p10, %p1437_p0  ;;  %p1217_p8 = por %p1216_p7, %p1215_p4 }
  0x59   : > { %p1211_p3 = pneg %p1210_p2 }
  0x5b   : > { %p1218_p11 = pnand %p1217_p8, %p1211_p3 }
  0x5d   : > { %1221 = shalt.err (!%p1218_p11)
}
  0x5e   : > { %1056 = dma.hbm_to_vmem [thread:$0]  (!%p1421_p12), %s1633_s9, 1024, %s348_s22, [#allocation6], %s1297_s17, %s1297_s17, %s1298_s28  }
  0x5f   : > { %p1656_p13 = scmp.ne.s32.totalorder %s1652_s29, 0 }
  0x60   : > { %p1657_p1 = scmp.eq.s32.totalorder (!%p1656_p13), %s1385_s21, 0 }
  0x61   : > { %375 = sbr.rel (%p1656_p13) target bundleno = 1138 (0x472), region = 64 }
  0x68   : > { %1267 = dma.done.wait (%p1657_p1), [#allocation3], 128   ;;  %p1658_p0 = pmov %p1657_p1 }
  0x6a   : > { %1269 = vsyncadd (%p1658_p0), [#allocation3], 4294967168  ;;  %p1659_p6 = pmov %p1658_p0 }
  0x6b   : > { %p1660_p5 = pmov %p1658_p0 }
  0x6c   : > { %1271 = dma.done.wait (%p1659_p6), [#allocation6], 1040  }
  0x6d   : > { %1273 = vsyncadd (%p1660_p5), [#allocation6], 4294966256  ;;  %s934_s4 = sshll.u32 %s1385_s21, 1  ;;  %v1299_v0 = vmov 0.0   ;;  %vm1300_vm0 = vmmov 0   ;;  %v1109_v1 = vld [vmem:[#allocation2] sm:$0xff]  }
  0x6e   : > { %987 = vmatprep.subr.bf16.mxu0 %v1299_v0  ;;  %989 = vmatprep.mubr.msk.bf16.mxu0 %vm1300_vm0, %v1299_v0  ;;  %p424_p12 = scmp.lt.s32.totalorder %s934_s4, 3  ;;  %vm449_vm1 = vcmask 130048   ;;  %v936_v5 = vld [vmem:[%s1626_s2] ss:$0 sm:$0xff]  ;;  %v1111_v15 = vld [vmem:[%s1629_s5 + $0x8] sm:$0xff]   ;;  %v1112_v16 = vld [vmem:[%s1629_s5 + $0x10] sm:$0xff]  }
  0x6f   : > { %993 = vmatprep.subr.bf16.mxu1 %v1299_v0  ;;  %1009 = vmatprep.mubr.msk.bf16.mxu1 %vm1300_vm0, %v1299_v0  ;;  %v1110_v14 = vld [vmem:[%s1629_s5] sm:$0xff]   ;;  %v1113_v17 = vld [vmem:[%s1629_s5 + $0x18] sm:$0xff]   ;;  %v1115_v19 = vld [vmem:[%s1629_s5 + $0x28] sm:$0xff]   ;;  %s966_s22 = sshll.u32 %s1385_s21, 8  ;;  %p1661_p10 = scmp.ne.s32.totalorder %s1649_s27, 0 }
  0x70   : > { %s1672_s4 = smov (!%p424_p12, %s934_s4), 3  ;;  %988 = vmatpush3.bf16.msra.mxu0 %v1109_v1  ;;  %994 = vmatpush3.bf16.msra.mxu1 %v1110_v14  ;;  %v1114_v18 = vld [vmem:[%s1629_s5 + $0x20] sm:$0xff]   ;;  %v1116_v20 = vld [vmem:[%s1629_s5 + $0x30] sm:$0xff]   ;;  %v1117_v21 = vld [vmem:[%s1629_s5 + $0x38] sm:$0xff]   ;;  %s1579_s30 = scalar_lea.hbm %s1635_s11, %s966_s22 }
  0x71   : > { %s935_s29 = sshll.u32 %s1672_s4, 3  ;;  %1013 = vmatprep.subr.bf16.mxu0 %v1299_v0  ;;  %995 = vmatprep.subr.bf16.mxu1 %v1299_v0  ;;  %v939_v38 = vld [vmem:[%s1627_s3] ss:$0 sm:$0xff]  ;;  %v940_v43 = vld [vmem:[#allocation5] ss:$0 sm:$0xff]  ;;  %v1118_v60 = vld [vmem:[#allocation7] sm:$0xff]  }
  0x72   : > { %s427_s13 = scalar_lea.vmem %s1624_s0, %s935_s29  ;;  %v941_v51 = vld [vmem:[%s1630_s6] ss:$0 sm:$0xff]  ;;  %v1119_v61 = vld [vmem:[#allocation7 + $0x8] sm:$0xff]   ;;  %v1121_v63 = vld [vmem:[#allocation7 + $0x18] sm:$0xff]   ;;  %s420_s29 = sand.u32 1, %s1284_s18  }
  0x73   : > { %v431_v2 = vld [vmem:[%s427_s13] sm:$0xff]  ;;  %v432_v3 = vld [vmem:[%s427_s13 + $0x8] sm:$0xff]  ;;  %s933_s15 = sshll.u32 %s420_s29, 4  ;;  %s1583_s16 = scalar_lea.sflag [#allocation4], %s420_s29 }
  0x74   : > { %v433_v4 = vpack.c.bf16 %v432_v3, %v431_v2  ;;  %996 = vmatpush3.bf16.msra.mxu1 %v1111_v15  ;;  %v1120_v62 = vld [vmem:[#allocation7 + $0x10] sm:$0xff]   ;;  %v1122_v1 = vld [vmem:[#allocation7 + $0x20] sm:$0xff]   ;;  %v1123_v2 = vld [vmem:[#allocation7 + $0x28] sm:$0xff]   ;;  %s422_s13 = scalar_lea.vmem [#allocation8], %s933_s15  ;;  %s1301_s21 = smov [#allocation8]  }
  0x75   : > { %997 = vmatprep.subr.bf16.mxu1 %v1299_v0  ;;  %v1124_v3 = vld [vmem:[#allocation7 + $0x30] sm:$0xff]   ;;  %s830_s17 = sshll.u32 %s422_s13, 4  ;;  %s1226_s19 = sshll.u32 %s1301_s21, 4  ;;  %s1581_s17 = int_to_ptr.vmem [resolvable:$true] %s830_s17  ;;  %s1227_s19 = int_to_ptr.vmem [resolvable:$false] %s1226_s19 }
  0x76   : > { %990 = vmatmul.mubr.msk.bf16.vlgmr.msra.gmra.mrb[0].mxu0 %vm449_vm1, %v433_v4  ;;  %v1125_v4 = vld [vmem:[#allocation7 + $0x38] sm:$0xff]   ;;  %s1222_s24 = scalar_lea.vmem %s1581_s17, 256  ;;  %s1228_s12 = scalar_lea.vmem %s1227_s19, 512 }
  0x77   : > { %1029 = vmatprep.mubr.msk.bf16.mxu0 %vm1300_vm0, %v1299_v0  ;;  %1014 = vmatpush3.bf16.msra.mxu0 %v1118_v60  ;;  %p1223_p9 = scmp.ne.s32.totalorder %s1581_s17, %s1222_s24  ;;  %p1229_p4 = scmp.lt.s32.totalorder %s1581_s17, %s1227_s19 }
  0x78   : > { %998 = vmatpush3.bf16.msra.mxu1 %v1112_v16  ;;  %1015 = vmatprep.subr.bf16.mxu0 %v1299_v0  ;;  %p1230_p7 = scmp.lt.s32.totalorder %s1228_s12, %s1222_s24 }
  0x79   : > { %999 = vmatprep.subr.bf16.mxu1 %v1299_v0  ;;  %p1224_p2 = pnand %p1223_p9, %p1661_p10 }
  0x7a   : > { %p1231_p8 = por %p1230_p7, %p1229_p4 }
  0x7b   : > { %1016 = vmatpush3.bf16.msra.mxu0 %v1119_v61  ;;  %p1225_p3 = pneg %p1224_p2 }
  0x7c   : > { %1000 = vmatpush3.bf16.msra.mxu1 %v1113_v17  ;;  %1017 = vmatprep.subr.bf16.mxu0 %v1299_v0 }
  0x7d   : > { %1001 = vmatprep.subr.bf16.mxu1 %v1299_v0  ;;  %p1232_p11 = pnand %p1231_p8, %p1225_p3 }
  0x7f   : > { %1018 = vmatpush3.bf16.msra.mxu0 %v1120_v62 }
  0x80   : > { %1002 = vmatpush3.bf16.msra.mxu1 %v1114_v18  ;;  %1019 = vmatprep.subr.bf16.mxu0 %v1299_v0 }
  0x81   : > { %1003 = vmatprep.subr.bf16.mxu1 %v1299_v0 }
  0x83   : > { %1020 = vmatpush3.bf16.msra.mxu0 %v1121_v63 }
  0x84   : > { %1004 = vmatpush3.bf16.msra.mxu1 %v1115_v19  ;;  %1021 = vmatprep.subr.bf16.mxu0 %v1299_v0 }
  0x85   : > { %1005 = vmatprep.subr.bf16.mxu1 %v1299_v0 }
  0x87   : > { %1022 = vmatpush3.bf16.msra.mxu0 %v1122_v1 }
  0x88   : > { %1006 = vmatpush3.bf16.msra.mxu1 %v1116_v20  ;;  %1023 = vmatprep.subr.bf16.mxu0 %v1299_v0 }
  0x89   : > { %1007 = vmatprep.subr.bf16.mxu1 %v1299_v0 }
  0x8b   : > { %1024 = vmatpush3.bf16.msra.mxu0 %v1123_v2 }
  0x8c   : > { %1008 = vmatpush3.bf16.msra.mxu1 %v1117_v21  ;;  %1025 = vmatprep.subr.bf16.mxu0 %v1299_v0 }
  0x8f   : > { %1026 = vmatpush3.bf16.msra.mxu0 %v1124_v3 }
  0x90   : > { %1027 = vmatprep.subr.bf16.mxu0 %v1299_v0  ;;  %v950_v0 = vld [vmem:[%s1631_s7] ss:$0 sm:$0xff] }
  0x93   : > { %1028 = vmatpush3.bf16.msra.mxu0 %v1125_v4 }
 0x149   : > { %v487_v6 = vpop.f32.mrb[0].mxu0 }
 0x14a   : > { %v488_v7 = vadd.f32 %v936_v5, %v487_v6  ;;  %v991_v8 = vpop.f32.mrb[1].mxu0 }
 0x14b   : > { %v490_v9 = vpop.f32.mrb[2].mxu0 }
 0x14c   : > { %v491_v10 = vadd.f32 %v936_v5, %v490_v9  ;;  %496 = vadd.xlane.f32.xlu0 %v488_v7  ;;  %v992_v11 = vpop.f32.mrb[3].mxu0  ;;  %v500_v12 = vmul.f32 %v488_v7, %v488_v7 }
 0x14e   : > { %502 = vadd.xlane.f32.xlu1 %v500_v12  ;;  %v501_v13 = vmul.f32 %v491_v10, %v491_v10 }
 0x150   : > { %498 = vadd.xlane.f32.xlu0 %v491_v10 }
 0x152   : > { %504 = vadd.xlane.f32.xlu1 %v501_v13 }
 0x1d9   : > { %v497_v22 = vpop.xlane.xlu0 %496 }
 0x1da   : > { %v506_v23 = vmul.f32 0.03125, %v497_v22 }
 0x1db   : > { %v503_v24 = vpop.xlane.xlu1 %502 }
 0x1dc   : > { %v510_v25 = vmul.f32 %v506_v23, %v506_v23  ;;  %v508_v26 = vmul.f32 0.03125, %v503_v24  ;;  %v518_v36 = vsub.f32 %v488_v7, %v506_v23  ;;  %v951_v24 = vld [vmem:[%s1632_s8] ss:$0 sm:$0xff] }
 0x1dd   : > { %v499_v27 = vpop.xlane.xlu0 %498 }
 0x1de   : > { %v512_v28 = vsub.f32 %v508_v26, %v510_v25  ;;  %v507_v29 = vmul.f32 0.03125, %v499_v27 }
 0x1df   : > { %v505_v30 = vpop.xlane.xlu1 %504 }
 0x1e0   : > { %v514_v31 = vadd.f32 1e-05, %v512_v28  ;;  %v511_v32 = vmul.f32 %v507_v29, %v507_v29  ;;  %v509_v33 = vmul.f32 0.03125, %v505_v30  ;;  %v519_v40 = vsub.f32 %v491_v10, %v507_v29 }
 0x1e2   : > { %1126 = vrsqrt.f32 %v514_v31  ;;  %v513_v34 = vsub.f32 %v509_v33, %v511_v32  ;;  %v952_v33 = vld [vmem:[%s1634_s10] ss:$0 sm:$0xff] }
 0x1e4   : > { %v515_v35 = vadd.f32 1e-05, %v513_v34 }
 0x1e6   : > { %1128 = vrsqrt.f32 %v515_v35 }
 0x1ec   : > { %v1127_v37 = vpop.eup %1126 }
 0x1ed   : > { %v520_v39 = vmul.f32 %v1127_v37, %v518_v36 }
 0x1ef   : > { %v528_v41 = vmul.f32 %v939_v38, %v520_v39 }
 0x1f0   : > { %v1129_v42 = vpop.eup %1128 }
 0x1f1   : > { %v521_v44 = vmul.f32 %v1129_v42, %v519_v40  ;;  %v536_v46 = vadd.f32 %v940_v43, %v528_v41 }
 0x1f3   : > { %v529_v45 = vmul.f32 %v939_v38, %v521_v44  ;;  %v538_v48 = vmax.f32 %v536_v46, 0.0 }
 0x1f5   : > { %v537_v47 = vadd.f32 %v940_v43, %v529_v45 }
 0x1f7   : > { %v539_v49 = vmax.f32 %v537_v47, 0.0 }
 0x1f9   : > { %v540_v50 = vpack.c.bf16 %v539_v49, %v538_v48 }
 0x1fb   : > { %1010 = vmatmul.mubr.bf16.vlgmr.msra.gmra.mrb[0].mxu1 %v540_v50 }
 0x2ce   : > { %v646_v52 = vpop.f32.mrb[0].mxu1 }
 0x2cf   : > { %v647_v53 = vadd.f32 %v941_v51, %v646_v52  ;;  %v1011_v54 = vpop.f32.mrb[1].mxu1 }
 0x2d0   : > { %v649_v55 = vpop.f32.mrb[2].mxu1 }
 0x2d1   : > { %v650_v56 = vadd.f32 %v941_v51, %v649_v55  ;;  %655 = vadd.xlane.f32.xlu0 %v647_v53  ;;  %v1012_v57 = vpop.f32.mrb[3].mxu1  ;;  %v659_v58 = vmul.f32 %v647_v53, %v647_v53 }
 0x2d3   : > { %657 = vadd.xlane.f32.xlu1 %v650_v56  ;;  %v660_v59 = vmul.f32 %v650_v56, %v650_v56 }
 0x2d5   : > { %661 = vadd.xlane.f32.xlu0 %v659_v58 }
 0x2d7   : > { %663 = vadd.xlane.f32.xlu1 %v660_v59 }
 0x35e   : > { %v656_v5 = vpop.xlane.xlu0 %655 }
 0x35f   : > { %v665_v6 = vmul.f32 0.03125, %v656_v5 }
 0x360   : > { %v658_v7 = vpop.xlane.xlu1 %657 }
 0x361   : > { %v666_v8 = vmul.f32 0.03125, %v658_v7  ;;  %v669_v10 = vmul.f32 %v665_v6, %v665_v6  ;;  %v677_v19 = vsub.f32 %v647_v53, %v665_v6 }
 0x362   : > { %v662_v9 = vpop.xlane.xlu0 %661 }
 0x363   : > { %v667_v11 = vmul.f32 0.03125, %v662_v9  ;;  %v670_v13 = vmul.f32 %v666_v8, %v666_v8  ;;  %v678_v21 = vsub.f32 %v650_v56, %v666_v8 }
 0x364   : > { %v664_v12 = vpop.xlane.xlu1 %663 }
 0x365   : > { %v671_v14 = vsub.f32 %v667_v11, %v669_v10  ;;  %v668_v15 = vmul.f32 0.03125, %v664_v12 }
 0x367   : > { %v673_v16 = vadd.f32 1e-05, %v671_v14  ;;  %v672_v17 = vsub.f32 %v668_v15, %v670_v13 }
 0x369   : > { %1130 = vrsqrt.f32 %v673_v16  ;;  %v674_v18 = vadd.f32 1e-05, %v672_v17 }
 0x36b   : > { %1132 = vrsqrt.f32 %v674_v18 }
 0x373   : > { %v1131_v20 = vpop.eup %1130 }
 0x374   : > { %v679_v22 = vmul.f32 %v1131_v20, %v677_v19 }
 0x375   : > { %v1133_v23 = vpop.eup %1132 }
 0x376   : > { %v680_v25 = vmul.f32 %v1133_v23, %v678_v21  ;;  %v687_v26 = vmul.f32 %v950_v0, %v679_v22 }
 0x378   : > { %v688_v27 = vmul.f32 %v950_v0, %v680_v25  ;;  %v695_v28 = vadd.f32 %v951_v24, %v687_v26 }
 0x37a   : > { %v696_v29 = vadd.f32 %v951_v24, %v688_v27  ;;  %v697_v30 = vmax.f32 %v695_v28, 0.0 }
 0x37c   : > { %v698_v31 = vmax.f32 %v696_v29, 0.0 }
 0x37e   : > { %v699_v32 = vpack.c.bf16 %v698_v31, %v697_v30 }
 0x380   : > { %1030 = vmatmul.mubr.bf16.vlgmr.msra.gmra.mrb[4].mxu0 %v699_v32 }
 0x453   : > { %v805_v34 = vpop.f32.mrb[4].mxu0 }
 0x454   : > { %v806_v35 = vadd.f32 %v952_v33, %v805_v34  ;;  %v1031_v36 = vpop.f32.mrb[5].mxu0 }
 0x455   : > { %v808_v37 = vpop.f32.mrb[6].mxu0 }
 0x456   : > { %1134 = vtanh.f32 %v806_v35  ;;  %v809_v38 = vadd.f32 %v952_v33, %v808_v37  ;;  %v1032_v39 = vpop.f32.mrb[7].mxu0 }
 0x458   : > { %1136 = vtanh.f32 %v809_v38 }
 0x460   : > { %v1135_v40 = vpop.eup %1134 }
 0x461   : > { %814 = vst [vmem:[%s422_s13] sm:$0xff] %v1135_v40 }
 0x462   : > { %v1137_v41 = vpop.eup %1136 }
 0x463   : > { %815 = vst [vmem:[%s422_s13 + $0x8] sm:$0xff] %v1137_v41 }
 0x464   : > { %1235 = shalt.err (!%p1232_p11)
}
 0x465   : > { %s1236_s26 = scalar_lea.hbm %s1579_s30, 256  ;;  %s1240_s4 = scalar_lea.hbm %s1635_s11, 512 }
 0x466   : > { %p1237_p13 = scmp.ne.s32.totalorder %s1579_s30, %s1236_s26  ;;  %p1241_p6 = scmp.lt.u32.totalorder %s1579_s30, %s1635_s11 }
 0x467   : > { %p1242_p5 = scmp.lt.u32.totalorder %s1240_s4, %s1236_s26  ;;  %p1244_p9 = scmp.lt.u32.totalorder %s1236_s26, %s1579_s30 }
 0x468   : > { %p1238_p1 = pnand %p1237_p13, %p1661_p10 }
 0x469   : > { %p1243_p12 = por %p1242_p5, %p1241_p6 }
 0x46a   : > { %p1239_p0 = pneg %p1238_p1 }
 0x46b   : > { %p1245_p2 = por %p1244_p9, %p1243_p12 }
 0x46d   : > { %p1246_p3 = pnand %p1245_p2, %p1239_p0 }
 0x46f   : > { %1249 = shalt.err (!%p1246_p3)
}
 0x470   : > { %s1302_s22 = smov 128   ;;  %s1303_s13 = smov 8  }
 0x471   : > { %1045 = dma.vmem_to_hbm [thread:$0]  (%p1661_p10), %s1581_s17, 256, %s1579_s30, %s1583_s16, %s1302_s22, %s1302_s22, %s1303_s13  }
 0x472 PF: > { %s1662_s28 = sld [smem:[#allocation12_spill]]  ;;  %s1663_s23 = sld [smem:[#allocation16_spill]] }
 0x473   : > { %p1067_p4 = scmp.ge.s32.totalorder %s1292_s20, 2 }
 0x478   : > { %s845_s24 = sand.u32 1, %s1662_s28   ;;  %p1664_p7 = scmp.ne.s32.totalorder %s1663_s23, 0 }
 0x479   : > { %s846_s21 = scalar_lea.sflag [#allocation4], %s845_s24 }
 0x47a   : > { %p1058_p8 = pnand %p1067_p4, %p1664_p7 }
 0x47c   : > { %1275 = dma.done.wait (!%p1058_p8), %s846_s21, 256  }
 0x47d   : > { %1277 = vsyncadd (!%p1058_p8), %s846_s21, 4294967040  ;;  %s1665_s20 = sld [smem:[#allocation14_spill]]  ;;  %s1666_s19 = sld [smem:[#allocation13_spill]] }
 0x47e   : > { %s1667_s12 = sld [smem:[#allocation15_spill]]  ;;  %s1668_s17 = smov %s1284_s18 }
 0x483   : > { %p23_p11 = scmp.ge.s32.totalorder %s1665_s20, 4   ;;  %s1669_s18 = smov %s1666_s19 }
 0x484   : > { %s1670_s19 = smov %s1667_s12 }
 0x485   :  { %25 = sbr.rel (!%p23_p11) target bundleno = 7 (0x7), region = 112 }
 0x48c   :  { %851 = vsyncpa [#allocation3], 1 }
 0x48d   :  { %853 = vsyncpa [#allocation3 + $0x1], 1 }
 0x48e   :  { %854 = vsyncpa [#allocation6], 1 }
 0x48f   :  { %855 = vsyncpa [#allocation4], 1 }
 0x490   :  { %857 = vsyncpa [#allocation4 + $0x1], 1 }

// kernel: tpu_custom_call.1
= control target key start
LH: loop header
LB: loop body
LE: loop exit
PB: predicated region body
PF: predicated region fallthrough
CT: control target
= control target key end

     0   :  { %s1624_s0 = inlined_call_operand.vmem [shape: f32[32,16], index: 0, kind: input, shape index: {}]   ;;  %s1625_s1 = inlined_call_operand.hbm [shape: bf16[16,128], index: 1, kind: input, shape index: {}]   ;;  %s1626_s2 = inlined_call_operand.vmem [shape: f32[1,128], index: 2, kind: input, shape index: {}]   ;;  %s1627_s3 = inlined_call_operand.vmem [shape: f32[1,128], index: 3, kind: input, shape index: {}]   ;;  %s1628_s4 = inlined_call_operand.hbm [shape: f32[1,128], index: 4, kind: input, shape index: {}]   ;;  %s1629_s5 = inlined_call_operand.vmem [shape: bf16[128,128], index: 5, kind: input, shape index: {}]   ;;  %s1630_s6 = inlined_call_operand.vmem [shape: f32[1,128], index: 6, kind: input, shape index: {}]   ;;  %s1631_s7 = inlined_call_operand.vmem [shape: f32[1,128], index: 7, kind: input, shape index: {}]   ;;  %s1632_s8 = inlined_call_operand.vmem [shape: f32[1,128], index: 8, kind: input, shape index: {}]   ;;  %s1633_s9 = inlined_call_operand.hbm [shape: bf16[128,128], index: 9, kind: input, shape index: {}]   ;;  %s1634_s10 = inlined_call_operand.vmem [shape: f32[1,128], index: 10, kind: input, shape index: {}]   ;;  %s1635_s11 = inlined_call_operand.hbm [shape: f32[32,128], index: 11, kind: output, shape index: {}]  }
   0x1   :  { %1644 = sst [smem:[#allocation17_spill]] %s1628_s4 }
   0x2   :  { %16 = vsyncpa [#allocation3], 0 }
   0x3   :  { %17 = vsyncpa [#allocation6], 0 }
   0x4   :  { %18 = vsyncpa [#allocation4], 0 }
   0x5   :  { %20 = vsyncpa [#allocation4 + $0x1], 0  ;;  %s1364_s17 = smov 0   ;;  %s1366_s18 = smov 0  }
   0x6   :  { %s1368_s19 = smov 0   ;;  %s1370_s20 = smov 0  }
   0x7 LB: > { %1645 = sst [smem:[#allocation12_spill]] %s1280_s17  ;;  %s1385_s21 = sadd.s32 4294967295, %s1292_s20   ;;  %s1292_s20 = sphi %s1370_s20, %s1665_s20   ;;  %s1288_s19 = sphi %s1368_s19, %s1670_s19   ;;  %s1284_s18 = sphi %s1366_s18, %s1669_s18   ;;  %s1280_s17 = sphi %s1364_s17, %s1668_s17  }
   0x8   : > { %1646 = sst [smem:[#allocation13_spill]] %s1288_s19  ;;  %s923_s22 = sadd.s32 4294967294, %s1292_s20  }
   0x9   : > { %s1389_s23 = sadd.s32 1, %s1292_s20   ;;  %s269_s24 = sadd.s32 1, %s1288_s19 }
   0xa   : > { %1647 = sst [smem:[#allocation14_spill]] %s1389_s23  ;;  %s266_s25 = ssub.s32 %s1292_s20, %s1389_s23 }
   0xb   : > { %p279_p0 = scmp.ne.s32.totalorder %s1288_s19, %s1284_s18  ;;  %p267_p1 = scmp.eq.s32.totalorder %s266_s25, 0 }
   0xc   : > { %p280_p2 = scmp.eq.s32.totalorder %s1385_s21, 1  ;;  %p285_p3 = scmp.ne.s32.totalorder %s1284_s18, %s1280_s17 }
   0xd   : > { %p286_p4 = scmp.eq.s32.totalorder %s923_s22, 1  ;;  %p924_p7 = scmp.ge.s32.totalorder %s1292_s20, 1 }
   0xe   : > { %s1400_s26 = scalar_select %p267_p1, %s1288_s19, %s269_s24  }
   0xf   : > { %p1402_p5 = por %p280_p2, %p279_p0  ;;  %p1406_p6 = por %p286_p4, %p285_p3 }
  0x10   : > { %1648 = sst [smem:[#allocation15_spill]] %s1400_s26  ;;  %p293_p8 = scmp.lt.s32.totalorder %s1292_s20, 3 }
  0x11   : > { %s1649_s27 = scalar_select %p1402_p5, 1, 0 }
  0x12   : > { %s1650_s28 = scalar_select %p1406_p6, 1, 0 }
  0x13   : > { %p1639_p9 = scmp.eq.s32.totalorder %s1385_s21, 0  ;;  %p1413_p10 = pnand %p924_p7, %p293_p8 }
  0x14   : > { %1651 = sst [smem:[#allocation16_spill]] %s1650_s28  ;;  %s1294_s30 = smov [#allocation5]  }
  0x15   : > { %s1652_s29 = scalar_select %p1413_p10, 1, 0 }
  0x16   : > { %s325_s12 = sshll.u32 %s1294_s30, 4  ;;  %p1047_p11 = pneg %p1413_p10  ;;  %s326_s12 = int_to_ptr.vmem [resolvable:$true] %s325_s12 }
  0x17   : > { %s1295_s13 = smov [#allocation2]   ;;  %s1296_s16 = smov [#allocation7]  }
  0x18   : > { %s305_s14 = sshll.u32 %s1295_s13, 4  ;;  %p1421_p12 = pnand %p1639_p9, %p1047_p11  ;;  %s1425_s14 = int_to_ptr.vmem [resolvable:$true] %s305_s14 }
  0x19   : > { %s1427_s22 = sshll.u32 %s1296_s16, 4  ;;  %s1654_s4 = sld [smem:[#allocation17_spill]]  ;;  %s348_s22 = int_to_ptr.vmem [resolvable:$true] %s1427_s22 }
  0x1a   : > { %p1437_p0 = pneg %p1421_p12 }
  0x1f   : > { %s1138_s30 = scalar_lea.hbm %s1654_s4, 16 }
  0x20   : > { %p1139_p13 = scmp.ne.s32.totalorder %s1654_s4, %s1138_s30  ;;  %p1145_p3 = scmp.lt.u32.totalorder %s1138_s30, %s1654_s4 }
  0x22   : > { %p1141_p1 = pnand %p1437_p0, %p1139_p13 }
  0x24   : > { %p1142_p2 = pneg %p1141_p1 }
  0x26   : > { %p1147_p4 = pnand %p1145_p3, %p1142_p2 }
  0x28   : > { %1150 = shalt.err (!%p1147_p4)
}
  0x29   : > { %s1151_s24 = scalar_lea.vmem %s326_s12, 16  ;;  %s1158_s19 = scalar_lea.vmem %s326_s12, 32 }
  0x2a   : > { %p1152_p7 = scmp.ne.s32.totalorder %s326_s12, %s1151_s24  ;;  %p1159_p9 = scmp.lt.s32.totalorder %s326_s12, %s326_s12 }
  0x2b   : > { %p1160_p6 = scmp.lt.s32.totalorder %s1158_s19, %s1151_s24 }
  0x2c   : > { %p1154_p8 = pnand %p1152_p7, %p1437_p0 }
  0x2d   : > { %p1161_p5 = por %p1160_p6, %p1159_p9 }
  0x2e   : > { %p1155_p11 = pneg %p1154_p8 }
  0x30   : > { %p1162_p10 = pnand %p1161_p5, %p1155_p11 }
  0x32   : > { %1165 = shalt.err (!%p1162_p10)
}
  0x33   : > { %1053 = dma.hbm_to_vmem [thread:$0]  (!%p1421_p12), %s1654_s4, 16, %s326_s12, [#allocation6]  }
  0x34   : > { %s1166_s16 = scalar_lea.hbm %s1625_s1, 128 }
  0x35   : > { %p1167_p13 = scmp.ne.s32.totalorder %s1625_s1, %s1166_s16  ;;  %p1173_p5 = scmp.lt.u32.totalorder %s1166_s16, %s1625_s1 }
  0x37   : > { %p1169_p1 = pnand %p1167_p13, %p1437_p0 }
  0x39   : > { %p1170_p6 = pneg %p1169_p1 }
  0x3b   : > { %p1175_p9 = pnand %p1173_p5, %p1170_p6 }
  0x3d   : > { %1178 = shalt.err (!%p1175_p9)
}
  0x3e   : > { %s1179_s12 = scalar_lea.vmem %s1425_s14, 128  ;;  %p1187_p4 = scmp.lt.s32.totalorder %s1425_s14, %s1425_s14 }
  0x3f   : > { %p1180_p10 = scmp.ne.s32.totalorder %s1425_s14, %s1179_s12  ;;  %p1188_p7 = scmp.lt.s32.totalorder %s1179_s12, %s1179_s12 }
  0x41   : > { %p1182_p2 = pnand %p1180_p10, %p1437_p0  ;;  %p1189_p8 = por %p1188_p7, %p1187_p4 }
  0x43   : > { %p1183_p3 = pneg %p1182_p2 }
  0x45   : > { %p1190_p11 = pnand %p1189_p8, %p1183_p3 }
  0x47   : > { %1193 = shalt.err (!%p1190_p11)
}
  0x48   : > { %s1297_s17 = smov 64   ;;  %s1298_s28 = smov 4  }
  0x49   : > { %1050 = dma.hbm_to_vmem [thread:$0]  (!%p1421_p12), %s1625_s1, 128, %s1425_s14, [#allocation3], %s1297_s17, %s1297_s17, %s1298_s28  }
  0x4a   : > { %s1194_s16 = scalar_lea.hbm %s1633_s9, 1024 }
  0x4b   : > { %p1195_p13 = scmp.ne.s32.totalorder %s1633_s9, %s1194_s16  ;;  %p1201_p5 = scmp.lt.u32.totalorder %s1194_s16, %s1633_s9 }
  0x4d   : > { %p1197_p1 = pnand %p1195_p13, %p1437_p0 }
  0x4f   : > { %p1198_p6 = pneg %p1197_p1 }
  0x51   : > { %p1203_p9 = pnand %p1201_p5, %p1198_p6 }
  0x53   : > { %1206 = shalt.err (!%p1203_p9)
}
  0x54   : > { %s1207_s26 = scalar_lea.vmem %s348_s22, 1024  ;;  %p1215_p4 = scmp.lt.s32.totalorder %s348_s22, %s348_s22 }
  0x55   : > { %p1208_p10 = scmp.ne.s32.totalorder %s348_s22, %s1207_s26  ;;  %p1216_p7 = scmp.lt.s32.totalorder %s1207_s26, %s1207_s26 }
  0x57   : > { %p1210_p2 = pnand %p1208_p10, %p1437_p0  ;;  %p1217_p8 = por %p1216_p7, %p1215_p4 }
  0x59   : > { %p1211_p3 = pneg %p1210_p2 }
  0x5b   : > { %p1218_p11 = pnand %p1217_p8, %p1211_p3 }
  0x5d   : > { %1221 = shalt.err (!%p1218_p11)
}
  0x5e   : > { %1056 = dma.hbm_to_vmem [thread:$0]  (!%p1421_p12), %s1633_s9, 1024, %s348_s22, [#allocation6], %s1297_s17, %s1297_s17, %s1298_s28  }
  0x5f   : > { %p1656_p13 = scmp.ne.s32.totalorder %s1652_s29, 0 }
  0x60   : > { %p1657_p1 = scmp.eq.s32.totalorder (!%p1656_p13), %s1385_s21, 0 }
  0x61   : > { %375 = sbr.rel (%p1656_p13) target bundleno = 1138 (0x472), region = 64 }
  0x68   : > { %1267 = dma.done.wait (%p1657_p1), [#allocation3], 128   ;;  %p1658_p0 = pmov %p1657_p1 }
  0x6a   : > { %1269 = vsyncadd (%p1658_p0), [#allocation3], 4294967168  ;;  %p1659_p6 = pmov %p1658_p0 }
  0x6b   : > { %p1660_p5 = pmov %p1658_p0 }
  0x6c   : > { %1271 = dma.done.wait (%p1659_p6), [#allocation6], 1040  }
  0x6d   : > { %1273 = vsyncadd (%p1660_p5), [#allocation6], 4294966256  ;;  %s934_s4 = sshll.u32 %s1385_s21, 1  ;;  %v1299_v0 = vmov 0.0   ;;  %vm1300_vm0 = vmmov 0   ;;  %v1109_v1 = vld [vmem:[#allocation2] sm:$0xff]  }
  0x6e   : > { %987 = vmatprep.subr.bf16.mxu0 %v1299_v0  ;;  %989 = vmatprep.mubr.msk.bf16.mxu0 %vm1300_vm0, %v1299_v0  ;;  %p424_p12 = scmp.lt.s32.totalorder %s934_s4, 3  ;;  %vm449_vm1 = vcmask 130048   ;;  %v936_v5 = vld [vmem:[%s1626_s2] ss:$0 sm:$0xff]  ;;  %v1111_v15 = vld [vmem:[%s1629_s5 + $0x8] sm:$0xff]   ;;  %v1112_v16 = vld [vmem:[%s1629_s5 + $0x10] sm:$0xff]  }
  0x6f   : > { %993 = vmatprep.subr.bf16.mxu1 %v1299_v0  ;;  %1009 = vmatprep.mubr.msk.bf16.mxu1 %vm1300_vm0, %v1299_v0  ;;  %v1110_v14 = vld [vmem:[%s1629_s5] sm:$0xff]   ;;  %v1113_v17 = vld [vmem:[%s1629_s5 + $0x18] sm:$0xff]   ;;  %v1115_v19 = vld [vmem:[%s1629_s5 + $0x28] sm:$0xff]   ;;  %s966_s22 = sshll.u32 %s1385_s21, 8  ;;  %p1661_p10 = scmp.ne.s32.totalorder %s1649_s27, 0 }
  0x70   : > { %s1672_s4 = smov (!%p424_p12, %s934_s4), 3  ;;  %988 = vmatpush3.bf16.msra.mxu0 %v1109_v1  ;;  %994 = vmatpush3.bf16.msra.mxu1 %v1110_v14  ;;  %v1114_v18 = vld [vmem:[%s1629_s5 + $0x20] sm:$0xff]   ;;  %v1116_v20 = vld [vmem:[%s1629_s5 + $0x30] sm:$0xff]   ;;  %v1117_v21 = vld [vmem:[%s1629_s5 + $0x38] sm:$0xff]   ;;  %s1579_s30 = scalar_lea.hbm %s1635_s11, %s966_s22 }
  0x71   : > { %s935_s29 = sshll.u32 %s1672_s4, 3  ;;  %1013 = vmatprep.subr.bf16.mxu0 %v1299_v0  ;;  %995 = vmatprep.subr.bf16.mxu1 %v1299_v0  ;;  %v939_v38 = vld [vmem:[%s1627_s3] ss:$0 sm:$0xff]  ;;  %v940_v43 = vld [vmem:[#allocation5] ss:$0 sm:$0xff]  ;;  %v1118_v60 = vld [vmem:[#allocation7] sm:$0xff]  }
  0x72   : > { %s427_s13 = scalar_lea.vmem %s1624_s0, %s935_s29  ;;  %v941_v51 = vld [vmem:[%s1630_s6] ss:$0 sm:$0xff]  ;;  %v1119_v61 = vld [vmem:[#allocation7 + $0x8] sm:$0xff]   ;;  %v1121_v63 = vld [vmem:[#allocation7 + $0x18] sm:$0xff]   ;;  %s420_s29 = sand.u32 1, %s1284_s18  }
  0x73   : > { %v431_v2 = vld [vmem:[%s427_s13] sm:$0xff]  ;;  %v432_v3 = vld [vmem:[%s427_s13 + $0x8] sm:$0xff]  ;;  %s933_s15 = sshll.u32 %s420_s29, 4  ;;  %s1583_s16 = scalar_lea.sflag [#allocation4], %s420_s29 }
  0x74   : > { %v433_v4 = vpack.c.bf16 %v432_v3, %v431_v2  ;;  %996 = vmatpush3.bf16.msra.mxu1 %v1111_v15  ;;  %v1120_v62 = vld [vmem:[#allocation7 + $0x10] sm:$0xff]   ;;  %v1122_v1 = vld [vmem:[#allocation7 + $0x20] sm:$0xff]   ;;  %v1123_v2 = vld [vmem:[#allocation7 + $0x28] sm:$0xff]   ;;  %s422_s13 = scalar_lea.vmem [#allocation8], %s933_s15  ;;  %s1301_s21 = smov [#allocation8]  }
  0x75   : > { %997 = vmatprep.subr.bf16.mxu1 %v1299_v0  ;;  %v1124_v3 = vld [vmem:[#allocation7 + $0x30] sm:$0xff]   ;;  %s830_s17 = sshll.u32 %s422_s13, 4  ;;  %s1226_s19 = sshll.u32 %s1301_s21, 4  ;;  %s1581_s17 = int_to_ptr.vmem [resolvable:$true] %s830_s17  ;;  %s1227_s19 = int_to_ptr.vmem [resolvable:$false] %s1226_s19 }
  0x76   : > { %990 = vmatmul.mubr.msk.bf16.vlgmr.msra.gmra.mrb[0].mxu0 %vm449_vm1, %v433_v4  ;;  %v1125_v4 = vld [vmem:[#allocation7 + $0x38] sm:$0xff]   ;;  %s1222_s24 = scalar_lea.vmem %s1581_s17, 256  ;;  %s1228_s12 = scalar_lea.vmem %s1227_s19, 512 }
  0x77   : > { %1029 = vmatprep.mubr.msk.bf16.mxu0 %vm1300_vm0, %v1299_v0  ;;  %1014 = vmatpush3.bf16.msra.mxu0 %v1118_v60  ;;  %p1223_p9 = scmp.ne.s32.totalorder %s1581_s17, %s1222_s24  ;;  %p1229_p4 = scmp.lt.s32.totalorder %s1581_s17, %s1227_s19 }
  0x78   : > { %998 = vmatpush3.bf16.msra.mxu1 %v1112_v16  ;;  %1015 = vmatprep.subr.bf16.mxu0 %v1299_v0  ;;  %p1230_p7 = scmp.lt.s32.totalorder %s1228_s12, %s1222_s24 }
  0x79   : > { %999 = vmatprep.subr.bf16.mxu1 %v1299_v0  ;;  %p1224_p2 = pnand %p1223_p9, %p1661_p10 }
  0x7a   : > { %p1231_p8 = por %p1230_p7, %p1229_p4 }
  0x7b   : > { %1016 = vmatpush3.bf16.msra.mxu0 %v1119_v61  ;;  %p1225_p3 = pneg %p1224_p2 }
  0x7c   : > { %1000 = vmatpush3.bf16.msra.mxu1 %v1113_v17  ;;  %1017 = vmatprep.subr.bf16.mxu0 %v1299_v0 }
  0x7d   : > { %1001 = vmatprep.subr.bf16.mxu1 %v1299_v0  ;;  %p1232_p11 = pnand %p1231_p8, %p1225_p3 }
  0x7f   : > { %1018 = vmatpush3.bf16.msra.mxu0 %v1120_v62 }
  0x80   : > { %1002 = vmatpush3.bf16.msra.mxu1 %v1114_v18  ;;  %1019 = vmatprep.subr.bf16.mxu0 %v1299_v0 }
  0x81   : > { %1003 = vmatprep.subr.bf16.mxu1 %v1299_v0 }
  0x83   : > { %1020 = vmatpush3.bf16.msra.mxu0 %v1121_v63 }
  0x84   : > { %1004 = vmatpush3.bf16.msra.mxu1 %v1115_v19  ;;  %1021 = vmatprep.subr.bf16.mxu0 %v1299_v0 }
  0x85   : > { %1005 = vmatprep.subr.bf16.mxu1 %v1299_v0 }
  0x87   : > { %1022 = vmatpush3.bf16.msra.mxu0 %v1122_v1 }
  0x88   : > { %1006 = vmatpush3.bf16.msra.mxu1 %v1116_v20  ;;  %1023 = vmatprep.subr.bf16.mxu0 %v1299_v0 }
  0x89   : > { %1007 = vmatprep.subr.bf16.mxu1 %v1299_v0 }
  0x8b   : > { %1024 = vmatpush3.bf16.msra.mxu0 %v1123_v2 }
  0x8c   : > { %1008 = vmatpush3.bf16.msra.mxu1 %v1117_v21  ;;  %1025 = vmatprep.subr.bf16.mxu0 %v1299_v0 }
  0x8f   : > { %1026 = vmatpush3.bf16.msra.mxu0 %v1124_v3 }
  0x90   : > { %1027 = vmatprep.subr.bf16.mxu0 %v1299_v0  ;;  %v950_v0 = vld [vmem:[%s1631_s7] ss:$0 sm:$0xff] }
  0x93   : > { %1028 = vmatpush3.bf16.msra.mxu0 %v1125_v4 }
 0x149   : > { %v487_v6 = vpop.f32.mrb[0].mxu0 }
 0x14a   : > { %v488_v7 = vadd.f32 %v936_v5, %v487_v6  ;;  %v991_v8 = vpop.f32.mrb[1].mxu0 }
 0x14b   : > { %v490_v9 = vpop.f32.mrb[2].mxu0 }
 0x14c   : > { %v491_v10 = vadd.f32 %v936_v5, %v490_v9  ;;  %496 = vadd.xlane.f32.xlu0 %v488_v7  ;;  %v992_v11 = vpop.f32.mrb[3].mxu0  ;;  %v500_v12 = vmul.f32 %v488_v7, %v488_v7 }
 0x14e   : > { %502 = vadd.xlane.f32.xlu1 %v500_v12  ;;  %v501_v13 = vmul.f32 %v491_v10, %v491_v10 }
 0x150   : > { %498 = vadd.xlane.f32.xlu0 %v491_v10 }
 0x152   : > { %504 = vadd.xlane.f32.xlu1 %v501_v13 }
 0x1d9   : > { %v497_v22 = vpop.xlane.xlu0 %496 }
 0x1da   : > { %v506_v23 = vmul.f32 0.03125, %v497_v22 }
 0x1db   : > { %v503_v24 = vpop.xlane.xlu1 %502 }
 0x1dc   : > { %v510_v25 = vmul.f32 %v506_v23, %v506_v23  ;;  %v508_v26 = vmul.f32 0.03125, %v503_v24  ;;  %v518_v36 = vsub.f32 %v488_v7, %v506_v23  ;;  %v951_v24 = vld [vmem:[%s1632_s8] ss:$0 sm:$0xff] }
 0x1dd   : > { %v499_v27 = vpop.xlane.xlu0 %498 }
 0x1de   : > { %v512_v28 = vsub.f32 %v508_v26, %v510_v25  ;;  %v507_v29 = vmul.f32 0.03125, %v499_v27 }
 0x1df   : > { %v505_v30 = vpop.xlane.xlu1 %504 }
 0x1e0   : > { %v514_v31 = vadd.f32 1e-05, %v512_v28  ;;  %v511_v32 = vmul.f32 %v507_v29, %v507_v29  ;;  %v509_v33 = vmul.f32 0.03125, %v505_v30  ;;  %v519_v40 = vsub.f32 %v491_v10, %v507_v29 }
 0x1e2   : > { %1126 = vrsqrt.f32 %v514_v31  ;;  %v513_v34 = vsub.f32 %v509_v33, %v511_v32  ;;  %v952_v33 = vld [vmem:[%s1634_s10] ss:$0 sm:$0xff] }
 0x1e4   : > { %v515_v35 = vadd.f32 1e-05, %v513_v34 }
 0x1e6   : > { %1128 = vrsqrt.f32 %v515_v35 }
 0x1ec   : > { %v1127_v37 = vpop.eup %1126 }
 0x1ed   : > { %v520_v39 = vmul.f32 %v1127_v37, %v518_v36 }
 0x1ef   : > { %v528_v41 = vmul.f32 %v939_v38, %v520_v39 }
 0x1f0   : > { %v1129_v42 = vpop.eup %1128 }
 0x1f1   : > { %v521_v44 = vmul.f32 %v1129_v42, %v519_v40  ;;  %v536_v46 = vadd.f32 %v940_v43, %v528_v41 }
 0x1f3   : > { %v529_v45 = vmul.f32 %v939_v38, %v521_v44  ;;  %v538_v48 = vmax.f32 %v536_v46, 0.0 }
 0x1f5   : > { %v537_v47 = vadd.f32 %v940_v43, %v529_v45 }
 0x1f7   : > { %v539_v49 = vmax.f32 %v537_v47, 0.0 }
 0x1f9   : > { %v540_v50 = vpack.c.bf16 %v539_v49, %v538_v48 }
 0x1fb   : > { %1010 = vmatmul.mubr.bf16.vlgmr.msra.gmra.mrb[0].mxu1 %v540_v50 }
 0x2ce   : > { %v646_v52 = vpop.f32.mrb[0].mxu1 }
 0x2cf   : > { %v647_v53 = vadd.f32 %v941_v51, %v646_v52  ;;  %v1011_v54 = vpop.f32.mrb[1].mxu1 }
 0x2d0   : > { %v649_v55 = vpop.f32.mrb[2].mxu1 }
 0x2d1   : > { %v650_v56 = vadd.f32 %v941_v51, %v649_v55  ;;  %655 = vadd.xlane.f32.xlu0 %v647_v53  ;;  %v1012_v57 = vpop.f32.mrb[3].mxu1  ;;  %v659_v58 = vmul.f32 %v647_v53, %v647_v53 }
 0x2d3   : > { %657 = vadd.xlane.f32.xlu1 %v650_v56  ;;  %v660_v59 = vmul.f32 %v650_v56, %v650_v56 }
 0x2d5   : > { %661 = vadd.xlane.f32.xlu0 %v659_v58 }
 0x2d7   : > { %663 = vadd.xlane.f32.xlu1 %v660_v59 }
 0x35e   : > { %v656_v5 = vpop.xlane.xlu0 %655 }
 0x35f   : > { %v665_v6 = vmul.f32 0.03125, %v656_v5 }
 0x360   : > { %v658_v7 = vpop.xlane.xlu1 %657 }
 0x361   : > { %v666_v8 = vmul.f32 0.03125, %v658_v7  ;;  %v669_v10 = vmul.f32 %v665_v6, %v665_v6  ;;  %v677_v19 = vsub.f32 %v647_v53, %v665_v6 }
 0x362   : > { %v662_v9 = vpop.xlane.xlu0 %661 }
 0x363   : > { %v667_v11 = vmul.f32 0.03125, %v662_v9  ;;  %v670_v13 = vmul.f32 %v666_v8, %v666_v8  ;;  %v678_v21 = vsub.f32 %v650_v56, %v666_v8 }
 0x364   : > { %v664_v12 = vpop.xlane.xlu1 %663 }
 0x365   : > { %v671_v14 = vsub.f32 %v667_v11, %v669_v10  ;;  %v668_v15 = vmul.f32 0.03125, %v664_v12 }
 0x367   : > { %v673_v16 = vadd.f32 1e-05, %v671_v14  ;;  %v672_v17 = vsub.f32 %v668_v15, %v670_v13 }
 0x369   : > { %1130 = vrsqrt.f32 %v673_v16  ;;  %v674_v18 = vadd.f32 1e-05, %v672_v17 }
 0x36b   : > { %1132 = vrsqrt.f32 %v674_v18 }
 0x373   : > { %v1131_v20 = vpop.eup %1130 }
 0x374   : > { %v679_v22 = vmul.f32 %v1131_v20, %v677_v19 }
 0x375   : > { %v1133_v23 = vpop.eup %1132 }
 0x376   : > { %v680_v25 = vmul.f32 %v1133_v23, %v678_v21  ;;  %v687_v26 = vmul.f32 %v950_v0, %v679_v22 }
 0x378   : > { %v688_v27 = vmul.f32 %v950_v0, %v680_v25  ;;  %v695_v28 = vadd.f32 %v951_v24, %v687_v26 }
 0x37a   : > { %v696_v29 = vadd.f32 %v951_v24, %v688_v27  ;;  %v697_v30 = vmax.f32 %v695_v28, 0.0 }
 0x37c   : > { %v698_v31 = vmax.f32 %v696_v29, 0.0 }
 0x37e   : > { %v699_v32 = vpack.c.bf16 %v698_v31, %v697_v30 }
 0x380   : > { %1030 = vmatmul.mubr.bf16.vlgmr.msra.gmra.mrb[4].mxu0 %v699_v32 }
 0x453   : > { %v805_v34 = vpop.f32.mrb[4].mxu0 }
 0x454   : > { %v806_v35 = vadd.f32 %v952_v33, %v805_v34  ;;  %v1031_v36 = vpop.f32.mrb[5].mxu0 }
 0x455   : > { %v808_v37 = vpop.f32.mrb[6].mxu0 }
 0x456   : > { %1134 = vtanh.f32 %v806_v35  ;;  %v809_v38 = vadd.f32 %v952_v33, %v808_v37  ;;  %v1032_v39 = vpop.f32.mrb[7].mxu0 }
 0x458   : > { %1136 = vtanh.f32 %v809_v38 }
 0x460   : > { %v1135_v40 = vpop.eup %1134 }
 0x461   : > { %814 = vst [vmem:[%s422_s13] sm:$0xff] %v1135_v40 }
 0x462   : > { %v1137_v41 = vpop.eup %1136 }
 0x463   : > { %815 = vst [vmem:[%s422_s13 + $0x8] sm:$0xff] %v1137_v41 }
 0x464   : > { %1235 = shalt.err (!%p1232_p11)
}
 0x465   : > { %s1236_s26 = scalar_lea.hbm %s1579_s30, 256  ;;  %s1240_s4 = scalar_lea.hbm %s1635_s11, 512 }
 0x466   : > { %p1237_p13 = scmp.ne.s32.totalorder %s1579_s30, %s1236_s26  ;;  %p1241_p6 = scmp.lt.u32.totalorder %s1579_s30, %s1635_s11 }
 0x467   : > { %p1242_p5 = scmp.lt.u32.totalorder %s1240_s4, %s1236_s26  ;;  %p1244_p9 = scmp.lt.u32.totalorder %s1236_s26, %s1579_s30 }
 0x468   : > { %p1238_p1 = pnand %p1237_p13, %p1661_p10 }
 0x469   : > { %p1243_p12 = por %p1242_p5, %p1241_p6 }
 0x46a   : > { %p1239_p0 = pneg %p1238_p1 }
 0x46b   : > { %p1245_p2 = por %p1244_p9, %p1243_p12 }
 0x46d   : > { %p1246_p3 = pnand %p1245_p2, %p1239_p0 }
 0x46f   : > { %1249 = shalt.err (!%p1246_p3)
}
 0x470   : > { %s1302_s22 = smov 128   ;;  %s1303_s13 = smov 8  }
 0x471   : > { %1045 = dma.vmem_to_hbm [thread:$0]  (%p1661_p10), %s1581_s17, 256, %s1579_s30, %s1583_s16, %s1302_s22, %s1302_s22, %s1303_s13  }
 0x472 PF: > { %s1662_s28 = sld [smem:[#allocation12_spill]]  ;;  %s1663_s23 = sld [smem:[#allocation16_spill]] }
 0x473   : > { %p1067_p4 = scmp.ge.s32.totalorder %s1292_s20, 2 }
 0x478   : > { %s845_s24 = sand.u32 1, %s1662_s28   ;;  %p1664_p7 = scmp.ne.s32.totalorder %s1663_s23, 0 }
 0x479   : > { %s846_s21 = scalar_lea.sflag [#allocation4], %s845_s24 }
 0x47a   : > { %p1058_p8 = pnand %p1067_p4, %p1664_p7 }
 0x47c   : > { %1275 = dma.done.wait (!%p1058_p8), %s846_s21, 256  }
 0x47d   : > { %1277 = vsyncadd (!%p1058_p8), %s846_s21, 4294967040  ;;  %s1665_s20 = sld [smem:[#allocation14_spill]]  ;;  %s1666_s19 = sld [smem:[#allocation13_spill]] }
 0x47e   : > { %s1667_s12 = sld [smem:[#allocation15_spill]]  ;;  %s1668_s17 = smov %s1284_s18 }
 0x483   : > { %p23_p11 = scmp.ge.s32.totalorder %s1665_s20, 4   ;;  %s1669_s18 = smov %s1666_s19 }
 0x484   : > { %s1670_s19 = smov %s1667_s12 }
 0x485   :  { %25 = sbr.rel (!%p23_p11) target bundleno = 7 (0x7), region = 112 }
 0x48c   :  { %851 = vsyncpa [#allocation3], 1 }
 0x48d   :  { %853 = vsyncpa [#allocation3 + $0x1], 1 }
 0x48e   :  { %854 = vsyncpa [#allocation6], 1 }
 0x48f   :  { %855 = vsyncpa [#allocation4], 1 }
 0x490   :  { %857 = vsyncpa [#allocation4 + $0x1], 1 }

</bundles_post_ra>
